<compile_context>
chip_gen: v5e
topology: v5e:2x2
jax: 0.10.0
libtpu: 0.0.40
codegen_flags: <defaults>
</compile_context>

<pallas_src>
import math

import jax
import jax.numpy as jnp
import numpy as np
from jax import lax
from jax.experimental import pallas as pl
from jax.experimental.pallas import tpu as pltpu

SCALE = math.sqrt(0.5)
NEG_INF = -1e30
LANE = 128
SUBLANE = 8


def _round_up(x, m):
    return (x + m - 1) // m * m


# ----------------------------- pure-JAX reference (sanity check) -------------------
def _linear(x, w, b):
    return jnp.dot(x, w, preferred_element_type=jnp.float32) + b


def _glu(x, h):
    return x[:, :h] * jax.nn.sigmoid(x[:, h:])


def _conv1d(x, w_taps, b, pad_left):
    s, cin = x.shape
    k = w_taps.shape[0]
    xp = jnp.zeros((s + k - 1, cin), x.dtype)
    xp = jax.lax.dynamic_update_slice(xp, x, (pad_left, 0))
    acc = jnp.zeros((s, w_taps.shape[2]), jnp.float32)
    for j in range(k):
        acc = acc + jnp.dot(xp[j:j + s, :], w_taps[j],
                            preferred_element_type=jnp.float32)
    return acc + b


def _reference_single(enc_emb, dec_emb,
                      e_e2h_w, e_e2h_b, e_conv_w, e_conv_b, e_h2e_w, e_h2e_b,
                      d_e2h_w, d_e2h_b, d_conv_w, d_conv_b,
                      a_h2e_w, a_h2e_b, a_e2h_w, a_e2h_b,
                      d_h2e_w, d_h2e_b, fc_w, fc_b):
    hid = e_e2h_w.shape[1]
    n_layers, k = e_conv_w.shape[0], e_conv_w.shape[1]

    x = _linear(enc_emb, e_e2h_w, e_e2h_b)
    for l in range(n_layers):
        c = _glu(_conv1d(x, e_conv_w[l], e_conv_b[l], (k - 1) // 2), hid)
        x = (c + x) * SCALE
    enc_conved = _linear(x, e_h2e_w, e_h2e_b)
    enc_combined = (enc_conved + enc_emb) * SCALE

    y = _linear(dec_emb, d_e2h_w, d_e2h_b)
    attn = jnp.zeros((dec_emb.shape[0], enc_emb.shape[0]), jnp.float32)
    for l in range(n_layers):
        c = _glu(_conv1d(y, d_conv_w[l], d_conv_b[l], k - 1), hid)
        c_emb = _linear(c, a_h2e_w, a_h2e_b)
        comb = (c_emb + dec_emb) * SCALE
        energy = jax.lax.dot_general(comb, enc_conved, (((1,), (1,)), ((), ())),
                                     preferred_element_type=jnp.float32)
        energy = energy - jnp.max(energy, axis=-1, keepdims=True)
        p = jnp.exp(energy)
        attn = p / jnp.sum(p, axis=-1, keepdims=True)
        attended = _linear(jnp.dot(attn, enc_combined,
                                   preferred_element_type=jnp.float32),
                           a_e2h_w, a_e2h_b)
        c = (c + attended) * SCALE
        y = (c + y) * SCALE
    dec_conved = _linear(y, d_h2e_w, d_h2e_b)
    out = _linear(dec_conved, fc_w, fc_b)
    return out, attn


# ----------------------------- Pallas kernel ---------------------------------------
def _make_kernel(*, n_layers, kernel_size, pad_enc, pad_dec):
    """Kernel closure over static config (layer count, tap count, conv paddings)."""
    bf16 = jnp.bfloat16

    def kernel(enc_emb_ref, dec_emb_ref,
               e_e2h_w, e_e2h_b, e_conv_w, e_conv_b, e_h2e_w, e_h2e_b,
               d_e2h_w, d_e2h_b, d_conv_w, d_conv_b,
               a_h2e_w, a_h2e_b, a_e2h_w, a_e2h_b,
               d_h2e_w, d_h2e_b, fc_w, fc_b,
               out_ref, attn_ref):
        bblk, ss_in, emb = enc_emb_ref.shape
        _, st_pad, _ = dec_emb_ref.shape
        ss_pad = attn_ref.shape[-1]
        hid = e_e2h_w.shape[-1]
        n_e = bblk * ss_in
        n_d = bblk * st_pad

        def make_taps(seq_len, n_rows, pad_left):
            # Per-tap (shift, keep-mask).  Rolling the *flat* [Bblk*S, H] activations
            # wraps across batch boundaries, but exactly those rows (pos-in-seq
            # outside the valid window) are the conv-padding zeros, so a single
            # mod-S positional mask handles both batch leakage and edge padding.
            pos = lax.broadcasted_iota(jnp.int32, (n_rows, hid), 0) % seq_len
            taps = []
            for j in range(kernel_size):
                s = pad_left - j
                if s == 0:
                    taps.append((0, None))
                elif s > 0:
                    taps.append((s, pos >= s))
                else:
                    taps.append((s, pos < seq_len + s))
            return taps

        def glu_conv(x_flat, taps, w_ref, b_ref, l):
            # Conv1d as K rolled (XLU) + masked inputs feeding K matmuls against the
            # fused [H, 2H] value|gate weight (2H lanes -> full-lane MXU pushes).
            n = x_flat.shape[0]
            two_h = w_ref.shape[-1]
            acc = jnp.zeros((n, two_h), jnp.float32)
            for j, (s, keep) in enumerate(taps):
                if s == 0:
                    xs = x_flat
                else:
                    xs = pltpu.roll(x_flat, shift=s % n, axis=0)
                    xs = jnp.where(keep, xs, 0.0)
                acc = acc + jnp.dot(xs.astype(bf16), w_ref[l, j],
                                    preferred_element_type=jnp.float32)
            acc = acc + b_ref[l]
            h = two_h // 2
            return acc[:, :h] * jax.nn.sigmoid(acc[:, h:])   # GLU (f32 VPU/EUP)

        enc_taps = make_taps(ss_in, n_e, pad_enc)
        dec_taps = make_taps(st_pad, n_d, pad_dec)

        # ----------------- encoder (batch folded into the matmul M dim) ---------
        enc_flat = enc_emb_ref[...].reshape(n_e, emb)
        x = jnp.dot(enc_flat.astype(bf16), e_e2h_w[...],
                    preferred_element_type=jnp.float32) + e_e2h_b[...]
        for l in range(n_layers):
            c = glu_conv(x, enc_taps, e_conv_w, e_conv_b, l)
            x = (c + x) * SCALE
        enc_conved = jnp.dot(x.astype(bf16), e_h2e_w[...],
                             preferred_element_type=jnp.float32) + e_h2e_b[...]
        enc_combined = (enc_conved + enc_flat) * SCALE

        # Hoisted, loop-invariant attention operands: pad the source axis to the
        # lane-dense ss_pad once and keep batched [Bblk, SsPad, E] views.
        ec3 = enc_conved.reshape(bblk, ss_in, emb)
        cb3 = enc_combined.reshape(bblk, ss_in, emb)
        if ss_pad > ss_in:
            zpad = jnp.zeros((bblk, ss_pad - ss_in, emb), jnp.float32)
            ec3 = jnp.concatenate([ec3, zpad], axis=1)
            cb3 = jnp.concatenate([cb3, zpad], axis=1)
            col = lax.broadcasted_iota(jnp.int32, (bblk, st_pad, ss_pad), 2)
            src_mask = col < ss_in
        else:
            src_mask = None
        enc_conved_pad = ec3              # f32 (feeds the softmax-critical energy)
        enc_comb_b = cb3.astype(bf16)     # bf16 (attended matmul)

        # Layer-invariant bias broadcasts hoisted out of the decoder layer loop.
        a_h2e_bias = jnp.broadcast_to(a_h2e_b[...], (n_d, emb))
        a_e2h_bias = jnp.broadcast_to(a_e2h_b[...], (n_d, hid))

        # ----------------- decoder (batch folded into the matmul M dim) ---------
        dec_flat = dec_emb_ref[...].reshape(n_d, emb)
        y = jnp.dot(dec_flat.astype(bf16), d_e2h_w[...],
                    preferred_element_type=jnp.float32) + d_e2h_b[...]
        attn = None
        for l in range(n_layers):
            c = glu_conv(y, dec_taps, d_conv_w, d_conv_b, l)
            c_emb = jnp.dot(c.astype(bf16), a_h2e_w[...],
                            preferred_element_type=jnp.float32) + a_h2e_bias
            comb = (c_emb + dec_flat) * SCALE
            comb3 = comb.reshape(bblk, st_pad, emb)
            # Energy kept f32: negligible FLOPs and it feeds the softmax.
            energy = jnp.einsum('bqe,bke->bqk', comb3, enc_conved_pad,
                                preferred_element_type=jnp.float32)
            if src_mask is not None:
                energy = jnp.where(src_mask, energy, NEG_INF)
            m = jnp.max(energy, axis=-1, keepdims=True)
            p = jnp.exp(energy - m)
            denom = jnp.sum(p, axis=-1, keepdims=True)
            attn = p * pl.reciprocal(denom, approx=False)      # exact softmax norm
            attended3 = jnp.einsum('bqk,bke->bqe', attn.astype(bf16), enc_comb_b,
                                   preferred_element_type=jnp.float32)
            attended = jnp.dot(attended3.reshape(n_d, emb).astype(bf16),
                               a_e2h_w[...],
                               preferred_element_type=jnp.float32) + a_e2h_bias
            c = (c + attended) * SCALE
            y = (c + y) * SCALE

        dec_conved = jnp.dot(y.astype(bf16), d_h2e_w[...],
                             preferred_element_type=jnp.float32) + d_h2e_b[...]
        out = jnp.dot(dec_conved.astype(bf16), fc_w[...],
                      preferred_element_type=jnp.float32) + fc_b[...]   # [N_d, VP]

        # Lane-dense, tile-aligned stores (last dims are multiples of 128).
        out_ref[...] = out.reshape(bblk, st_pad, out_ref.shape[-1]).astype(out_ref.dtype)
        attn_ref[...] = attn.astype(attn_ref.dtype)

    return kernel


def encoder_decoder_forward(enc_emb, dec_emb, raw_weights, *, num_shards=1):
    """enc_emb: [B, Ss, E], dec_emb: [B, St, E]; returns (out [B,St,V], attn [B,St,Ss]).

    num_shards: leading "parallel" grid axis (set 2 on v7x to use both TensorCores;
    keep 1 on single-TC v5e/v6e where a grid step is pure serialization).
    """
    (e_e2h_w, e_e2h_b, e_conv_w, e_conv_b, e_h2e_w, e_h2e_b,
     d_e2h_w, d_e2h_b, d_conv_w, d_conv_b,
     a_h2e_w, a_h2e_b, a_e2h_w, a_e2h_b,
     d_h2e_w, d_h2e_b, fc_w, fc_b) = raw_weights

    B, Ss, E = enc_emb.shape
    _, St, _ = dec_emb.shape
    H = e_e2h_w.shape[1]
    L, K = e_conv_w.shape[0], e_conv_w.shape[1]
    V = fc_w.shape[1]

    # TODO(synk): general Ss would need wrapper padding + per-layer row masking in
    # the encoder; not required at these shapes.
    assert Ss % SUBLANE == 0, "source length must be a multiple of 8"
    assert B % num_shards == 0
    Bblk = B // num_shards

    StP = _round_up(St, SUBLANE)      # tile-aligned decoder length (causal: safe)
    SsPad = _round_up(Ss, LANE)       # lane-dense attention width
    VP = _round_up(V, LANE)           # lane-dense logits width
    f32, bf16 = jnp.float32, jnp.bfloat16

    # --- lane-pad fc_out so the logits store is a full-lane unmasked vst.
    # TODO(synk): at production vocab sizes (esp. v7x 64 MiB VMEM) add a vocab-tile
    # grid axis / emit_pipeline so fc_w streams HBM->VMEM instead of sitting resident.
    fc_w_p = jnp.zeros((E, VP), f32).at[:, :V].set(fc_w).astype(bf16)
    fc_b_p = jnp.zeros((1, VP), f32).at[:, :V].set(fc_b)

    # --- sublane-pad the decoder sequence so per-batch slices stay tile-aligned.
    # (Padded rows cannot contaminate real rows under the causal conv; cropped below.)
    dec_emb_p = jnp.zeros((B, StP, E), f32).at[:, :St, :].set(dec_emb)

    # --- bf16 weights for the MXU path (biases stay f32: added to f32 accumulators).
    weights = [
        e_e2h_w.astype(bf16), e_e2h_b, e_conv_w.astype(bf16), e_conv_b,
        e_h2e_w.astype(bf16), e_h2e_b,
        d_e2h_w.astype(bf16), d_e2h_b, d_conv_w.astype(bf16), d_conv_b,
        a_h2e_w.astype(bf16), a_h2e_b, a_e2h_w.astype(bf16), a_e2h_b,
        d_h2e_w.astype(bf16), d_h2e_b, fc_w_p, fc_b_p,
    ]

    def full_spec(arr):
        nd = arr.ndim
        # TODO(synk): on v7x these grid-invariant weight blocks can use
        # pipeline_mode=pl.Buffered(1) to drop the wasted double-buffer copy.
        return pl.BlockSpec(arr.shape, lambda s, _n=nd: (0,) * _n)

    in_specs = ([pl.BlockSpec((Bblk, Ss, E), lambda s: (s, 0, 0)),
                 pl.BlockSpec((Bblk, StP, E), lambda s: (s, 0, 0))]
                + [full_spec(w) for w in weights])
    out_specs = (pl.BlockSpec((Bblk, StP, VP), lambda s: (s, 0, 0)),
                 pl.BlockSpec((Bblk, StP, SsPad), lambda s: (s, 0, 0)))
    out_shape = (jax.ShapeDtypeStruct((B, StP, VP), f32),
                 jax.ShapeDtypeStruct((B, StP, SsPad), f32))

    # Explicit VMEM budget: double-buffered operand/output blocks + activation slack.
    block_bytes = 4 * Bblk * StP * (VP + SsPad) + 4 * Bblk * (Ss + StP) * E
    weight_bytes = sum(int(np.prod(w.shape)) * w.dtype.itemsize for w in weights)
    vmem_limit = int(min(max(2 * (block_bytes + weight_bytes) + (8 << 20), 32 << 20),
                         64 << 20))

    kernel = _make_kernel(n_layers=L, kernel_size=K,
                          pad_enc=(K - 1) // 2, pad_dec=K - 1)

    out_p, attn_p = pl.pallas_call(
        kernel,
        grid=(num_shards,),
        in_specs=in_specs,
        out_specs=out_specs,
        out_shape=out_shape,
        compiler_params=pltpu.CompilerParams(
            dimension_semantics=("parallel",),
            vmem_limit_bytes=vmem_limit),
    )(enc_emb, dec_emb_p, *weights)

    # Crop wrapper-side padding (vocab lanes, source lanes, decoder rows).
    return out_p[:, :St, :V], attn_p[:, :St, :Ss]


# ----------------------------- driver ----------------------------------------------
if __name__ == "__main__":
    key = jax.random.PRNGKey(0)
    B, Ss, St = 2, 8, 6                 # batch, src_len, trg_len
    E, H, K, L = 32, 64, 3, 2           # emb_dim, hid_dim, kernel_size, n_layers
    V_in, V_out, MAXLEN = 30, 24, 16    # vocab sizes, max positional length

    ks = jax.random.split(key, 32)

    def rnd(i, shape, scale=0.1):
        return jax.random.normal(ks[i], shape, jnp.float32) * scale

    # embedding tables (gathers are plain-JAX glue)
    enc_tok_table = rnd(0, (V_in, E), 1.0)
    enc_pos_table = rnd(1, (MAXLEN, E), 1.0)
    dec_tok_table = rnd(2, (V_out, E), 1.0)
    dec_pos_table = rnd(3, (MAXLEN, E), 1.0)

    raw_weights = [
        rnd(4, (E, H)), rnd(5, (1, H)),                      # encoder emb2hid
        rnd(6, (L, K, H, 2 * H)), rnd(7, (L, 1, 2 * H)),     # encoder convs (tap-major)
        rnd(8, (H, E)), rnd(9, (1, E)),                      # encoder hid2emb
        rnd(10, (E, H)), rnd(11, (1, H)),                    # decoder emb2hid
        rnd(12, (L, K, H, 2 * H)), rnd(13, (L, 1, 2 * H)),   # decoder causal convs
        rnd(14, (H, E)), rnd(15, (1, E)),                    # attn_hid2emb
        rnd(16, (E, H)), rnd(17, (1, H)),                    # attn_emb2hid
        rnd(18, (H, E)), rnd(19, (1, E)),                    # decoder hid2emb
        rnd(20, (E, V_out)), rnd(21, (1, V_out)),            # fc_out
    ]

    enc_inp = jax.random.randint(ks[22], (B, Ss), 0, V_in)   # token ids
    dec_inp = jax.random.randint(ks[23], (B, St), 0, V_out)  # token ids

    # TODO(synk): dropout layers are treated as identity (eval-mode forward).
    enc_emb = enc_tok_table[enc_inp] + enc_pos_table[jnp.arange(Ss)][None, :, :]
    dec_emb = dec_tok_table[dec_inp] + dec_pos_table[jnp.arange(St)][None, :, :]

    out, attn = encoder_decoder_forward(enc_emb, dec_emb, raw_weights)
    jax.block_until_ready((out, attn))

    # pure-JAX f32 reference of the same math.  The kernel runs its big matmuls with
    # bf16 operands (f32 accumulate) per the perf review, so the comparison uses a
    # bf16-appropriate tolerance; the softmax path (energy + normalization) is exact.
    ref_out, ref_attn = jax.vmap(
        _reference_single, in_axes=(0, 0) + (None,) * len(raw_weights)
    )(enc_emb, dec_emb, *raw_weights)
    assert out.shape == (B, St, V_out) and attn.shape == (B, St, Ss)
    np.testing.assert_allclose(np.asarray(out), np.asarray(ref_out), rtol=2e-2, atol=2e-2)
    np.testing.assert_allclose(np.asarray(attn), np.asarray(ref_attn), rtol=2e-2, atol=2e-2)

    print("KERNEL_OK")
</pallas_src>

<mosaic_0001>
module attributes {stable_mosaic.version = 11 : i64} {
  func.func @kernel(%arg0: i32, %arg1: memref<2x8x32xf32, #tpu.memory_space<vmem>>, %arg2: memref<2x8x32xf32, #tpu.memory_space<vmem>>, %arg3: memref<32x64xbf16, #tpu.memory_space<vmem>>, %arg4: memref<1x64xf32, #tpu.memory_space<vmem>>, %arg5: memref<2x3x64x128xbf16, #tpu.memory_space<vmem>>, %arg6: memref<2x1x128xf32, #tpu.memory_space<vmem>>, %arg7: memref<64x32xbf16, #tpu.memory_space<vmem>>, %arg8: memref<1x32xf32, #tpu.memory_space<vmem>>, %arg9: memref<32x64xbf16, #tpu.memory_space<vmem>>, %arg10: memref<1x64xf32, #tpu.memory_space<vmem>>, %arg11: memref<2x3x64x128xbf16, #tpu.memory_space<vmem>>, %arg12: memref<2x1x128xf32, #tpu.memory_space<vmem>>, %arg13: memref<64x32xbf16, #tpu.memory_space<vmem>>, %arg14: memref<1x32xf32, #tpu.memory_space<vmem>>, %arg15: memref<32x64xbf16, #tpu.memory_space<vmem>>, %arg16: memref<1x64xf32, #tpu.memory_space<vmem>>, %arg17: memref<64x32xbf16, #tpu.memory_space<vmem>>, %arg18: memref<1x32xf32, #tpu.memory_space<vmem>>, %arg19: memref<32x128xbf16, #tpu.memory_space<vmem>>, %arg20: memref<1x128xf32, #tpu.memory_space<vmem>>, %arg21: memref<2x8x128xf32, #tpu.memory_space<vmem>>, %arg22: memref<2x8x128xf32, #tpu.memory_space<vmem>>) attributes {dimension_semantics = [#tpu.dimension_semantics<parallel>], iteration_bounds = array<i64: 1>, scalar_prefetch = 0 : i64, scratch_operands = 0 : i64, tpu.core_type = #tpu.core_type<tc>, window_params = [{transform_indices = @transform_0, window_bounds = array<i64: 2, 8, 32>}, {transform_indices = @transform_1, window_bounds = array<i64: 2, 8, 32>}, {pipeline_mode = #tpu.pipeline_mode<synchronous>, transform_indices = @transform_2, window_bounds = array<i64: 32, 64>}, {pipeline_mode = #tpu.pipeline_mode<synchronous>, transform_indices = @transform_3, window_bounds = array<i64: 1, 64>}, {pipeline_mode = #tpu.pipeline_mode<synchronous>, transform_indices = @transform_4, window_bounds = array<i64: 2, 3, 64, 128>}, {pipeline_mode = #tpu.pipeline_mode<synchronous>, transform_indices = @transform_5, window_bounds = array<i64: 2, 1, 128>}, {pipeline_mode = #tpu.pipeline_mode<synchronous>, transform_indices = @transform_6, window_bounds = array<i64: 64, 32>}, {pipeline_mode = #tpu.pipeline_mode<synchronous>, transform_indices = @transform_7, window_bounds = array<i64: 1, 32>}, {pipeline_mode = #tpu.pipeline_mode<synchronous>, transform_indices = @transform_8, window_bounds = array<i64: 32, 64>}, {pipeline_mode = #tpu.pipeline_mode<synchronous>, transform_indices = @transform_9, window_bounds = array<i64: 1, 64>}, {pipeline_mode = #tpu.pipeline_mode<synchronous>, transform_indices = @transform_10, window_bounds = array<i64: 2, 3, 64, 128>}, {pipeline_mode = #tpu.pipeline_mode<synchronous>, transform_indices = @transform_11, window_bounds = array<i64: 2, 1, 128>}, {pipeline_mode = #tpu.pipeline_mode<synchronous>, transform_indices = @transform_12, window_bounds = array<i64: 64, 32>}, {pipeline_mode = #tpu.pipeline_mode<synchronous>, transform_indices = @transform_13, window_bounds = array<i64: 1, 32>}, {pipeline_mode = #tpu.pipeline_mode<synchronous>, transform_indices = @transform_14, window_bounds = array<i64: 32, 64>}, {pipeline_mode = #tpu.pipeline_mode<synchronous>, transform_indices = @transform_15, window_bounds = array<i64: 1, 64>}, {pipeline_mode = #tpu.pipeline_mode<synchronous>, transform_indices = @transform_16, window_bounds = array<i64: 64, 32>}, {pipeline_mode = #tpu.pipeline_mode<synchronous>, transform_indices = @transform_17, window_bounds = array<i64: 1, 32>}, {pipeline_mode = #tpu.pipeline_mode<synchronous>, transform_indices = @transform_18, window_bounds = array<i64: 32, 128>}, {pipeline_mode = #tpu.pipeline_mode<synchronous>, transform_indices = @transform_19, window_bounds = array<i64: 1, 128>}, {transform_indices = @transform_20, window_bounds = array<i64: 2, 8, 128>}, {transform_indices = @transform_21, window_bounds = array<i64: 2, 8, 128>}]} {
    %0 = tpu.iota {dimensions = array<i32: 0>} : vector<16x64xi32>
    %c8_i32 = arith.constant 8 : i32
    %c0_i32 = arith.constant 0 : i32
    %1 = arith.cmpi eq, %c8_i32, %c0_i32 : i32
    %c1_i32 = arith.constant 1 : i32
    %2 = arith.select %1, %c1_i32, %c8_i32 : i32
    %3 = vector.broadcast %2 : i32 to vector<16x64xi32>
    %4 = arith.remsi %0, %3 : vector<16x64xi32>
    %c0_i32_0 = arith.constant 0 : i32
    %5 = vector.broadcast %c0_i32_0 : i32 to vector<16x64xi32>
    %6 = arith.cmpi ne, %4, %5 : vector<16x64xi32>
    %c0_i32_1 = arith.constant 0 : i32
    %7 = vector.broadcast %c0_i32_1 : i32 to vector<16x64xi32>
    %8 = arith.cmpi slt, %4, %7 : vector<16x64xi32>
    %c0_i32_2 = arith.constant 0 : i32
    %9 = arith.cmpi slt, %2, %c0_i32_2 : i32
    %10 = vector.broadcast %9 : i1 to vector<16x64xi1>
    %11 = vector.broadcast %10 : vector<16x64xi1> to vector<16x64xi1>
    %12 = arith.xori %8, %11 : vector<16x64xi1>
    %13 = arith.andi %12, %6 : vector<16x64xi1>
    %14 = vector.broadcast %2 : i32 to vector<16x64xi32>
    %15 = arith.addi %4, %14 : vector<16x64xi32>
    %16 = arith.select %13, %15, %4 : vector<16x64xi1>, vector<16x64xi32>
    %c1_i32_3 = arith.constant 1 : i32
    %17 = vector.broadcast %c1_i32_3 : i32 to vector<16x64xi32>
    %18 = arith.cmpi sge, %16, %17 : vector<16x64xi32>
    %c7_i32 = arith.constant 7 : i32
    %19 = vector.broadcast %c7_i32 : i32 to vector<16x64xi32>
    %20 = arith.cmpi slt, %16, %19 : vector<16x64xi32>
    %21 = tpu.iota {dimensions = array<i32: 0>} : vector<16x64xi32>
    %c8_i32_4 = arith.constant 8 : i32
    %c0_i32_5 = arith.constant 0 : i32
    %22 = arith.cmpi eq, %c8_i32_4, %c0_i32_5 : i32
    %c1_i32_6 = arith.constant 1 : i32
    %23 = arith.select %22, %c1_i32_6, %c8_i32_4 : i32
    %24 = vector.broadcast %23 : i32 to vector<16x64xi32>
    %25 = arith.remsi %21, %24 : vector<16x64xi32>
    %c0_i32_7 = arith.constant 0 : i32
    %26 = vector.broadcast %c0_i32_7 : i32 to vector<16x64xi32>
    %27 = arith.cmpi ne, %25, %26 : vector<16x64xi32>
    %c0_i32_8 = arith.constant 0 : i32
    %28 = vector.broadcast %c0_i32_8 : i32 to vector<16x64xi32>
    %29 = arith.cmpi slt, %25, %28 : vector<16x64xi32>
    %c0_i32_9 = arith.constant 0 : i32
    %30 = arith.cmpi slt, %23, %c0_i32_9 : i32
    %31 = vector.broadcast %30 : i1 to vector<16x64xi1>
    %32 = vector.broadcast %31 : vector<16x64xi1> to vector<16x64xi1>
    %33 = arith.xori %29, %32 : vector<16x64xi1>
    %34 = arith.andi %33, %27 : vector<16x64xi1>
    %35 = vector.broadcast %23 : i32 to vector<16x64xi32>
    %36 = arith.addi %25, %35 : vector<16x64xi32>
    %37 = arith.select %34, %36, %25 : vector<16x64xi1>, vector<16x64xi32>
    %c2_i32 = arith.constant 2 : i32
    %38 = vector.broadcast %c2_i32 : i32 to vector<16x64xi32>
    %39 = arith.cmpi sge, %37, %38 : vector<16x64xi32>
    %c1_i32_10 = arith.constant 1 : i32
    %40 = vector.broadcast %c1_i32_10 : i32 to vector<16x64xi32>
    %41 = arith.cmpi sge, %37, %40 : vector<16x64xi32>
    %c0 = arith.constant 0 : index
    %c0_11 = arith.constant 0 : index
    %c0_12 = arith.constant 0 : index
    %42 = vector.load %arg1[%c0, %c0_11, %c0_12] : memref<2x8x32xf32, #tpu.memory_space<vmem>>, vector<2x8x32xf32>
    %43 = vector.shape_cast %42 : vector<2x8x32xf32> to vector<16x32xf32>
    %44 = arith.truncf %43 : vector<16x32xf32> to vector<16x32xbf16>
    %c0_13 = arith.constant 0 : index
    %c0_14 = arith.constant 0 : index
    %45 = vector.load %arg3[%c0_13, %c0_14] : memref<32x64xbf16, #tpu.memory_space<vmem>>, vector<32x64xbf16>
    %cst = arith.constant dense<0.000000e+00> : vector<16x64xf32>
    %46 = tpu.matmul %44, %45, %cst {dimension_numbers = #tpu.dot_dimension_numbers<[1], [0], [0], [1], [0, 0, 1, 1], [], []>} : vector<16x32xbf16>, vector<32x64xbf16>, vector<16x64xf32> -> vector<16x64xf32>
    %c0_15 = arith.constant 0 : index
    %c0_16 = arith.constant 0 : index
    %47 = vector.load %arg4[%c0_15, %c0_16] : memref<1x64xf32, #tpu.memory_space<vmem>>, vector<1x64xf32>
    %48 = vector.broadcast %47 : vector<1x64xf32> to vector<16x64xf32>
    %49 = arith.addf %46, %48 : vector<16x64xf32>
    %cst_17 = arith.constant 0.000000e+00 : f32
    %50 = vector.broadcast %cst_17 : f32 to vector<16x128xf32>
    %c1_i32_18 = arith.constant 1 : i32
    %51 = tpu.dynamic_rotate %49 by %c1_i32_18 dim 0 : vector<16x64xf32>, i32 -> vector<16x64xf32>
    %cst_19 = arith.constant 0.000000e+00 : f32
    %52 = vector.broadcast %cst_19 : f32 to vector<16x64xf32>
    %53 = arith.select %18, %51, %52 : vector<16x64xi1>, vector<16x64xf32>
    %54 = arith.truncf %53 : vector<16x64xf32> to vector<16x64xbf16>
    %c0_20 = arith.constant 0 : index
    %c0_21 = arith.constant 0 : index
    %c0_22 = arith.constant 0 : index
    %c0_23 = arith.constant 0 : index
    %55 = vector.load %arg5[%c0_20, %c0_21, %c0_22, %c0_23] : memref<2x3x64x128xbf16, #tpu.memory_space<vmem>>, vector<1x1x64x128xbf16>
    %56 = vector.shape_cast %55 : vector<1x1x64x128xbf16> to vector<64x128xbf16>
    %cst_24 = arith.constant dense<0.000000e+00> : vector<16x128xf32>
    %57 = tpu.matmul %54, %56, %cst_24 {dimension_numbers = #tpu.dot_dimension_numbers<[1], [0], [0], [1], [0, 0, 1, 1], [], []>} : vector<16x64xbf16>, vector<64x128xbf16>, vector<16x128xf32> -> vector<16x128xf32>
    %58 = arith.addf %50, %57 : vector<16x128xf32>
    %59 = arith.truncf %49 : vector<16x64xf32> to vector<16x64xbf16>
    %c0_25 = arith.constant 0 : index
    %c1 = arith.constant 1 : index
    %c0_26 = arith.constant 0 : index
    %c0_27 = arith.constant 0 : index
    %60 = vector.load %arg5[%c0_25, %c1, %c0_26, %c0_27] : memref<2x3x64x128xbf16, #tpu.memory_space<vmem>>, vector<1x1x64x128xbf16>
    %61 = vector.shape_cast %60 : vector<1x1x64x128xbf16> to vector<64x128xbf16>
    %cst_28 = arith.constant dense<0.000000e+00> : vector<16x128xf32>
    %62 = tpu.matmul %59, %61, %cst_28 {dimension_numbers = #tpu.dot_dimension_numbers<[1], [0], [0], [1], [0, 0, 1, 1], [], []>} : vector<16x64xbf16>, vector<64x128xbf16>, vector<16x128xf32> -> vector<16x128xf32>
    %63 = arith.addf %58, %62 : vector<16x128xf32>
    %c15_i32 = arith.constant 15 : i32
    %64 = tpu.dynamic_rotate %49 by %c15_i32 dim 0 : vector<16x64xf32>, i32 -> vector<16x64xf32>
    %cst_29 = arith.constant 0.000000e+00 : f32
    %65 = vector.broadcast %cst_29 : f32 to vector<16x64xf32>
    %66 = arith.select %20, %64, %65 : vector<16x64xi1>, vector<16x64xf32>
    %67 = arith.truncf %66 : vector<16x64xf32> to vector<16x64xbf16>
    %c0_30 = arith.constant 0 : index
    %c2 = arith.constant 2 : index
    %c0_31 = arith.constant 0 : index
    %c0_32 = arith.constant 0 : index
    %68 = vector.load %arg5[%c0_30, %c2, %c0_31, %c0_32] : memref<2x3x64x128xbf16, #tpu.memory_space<vmem>>, vector<1x1x64x128xbf16>
    %69 = vector.shape_cast %68 : vector<1x1x64x128xbf16> to vector<64x128xbf16>
    %cst_33 = arith.constant dense<0.000000e+00> : vector<16x128xf32>
    %70 = tpu.matmul %67, %69, %cst_33 {dimension_numbers = #tpu.dot_dimension_numbers<[1], [0], [0], [1], [0, 0, 1, 1], [], []>} : vector<16x64xbf16>, vector<64x128xbf16>, vector<16x128xf32> -> vector<16x128xf32>
    %71 = arith.addf %63, %70 : vector<16x128xf32>
    %c0_34 = arith.constant 0 : index
    %c0_35 = arith.constant 0 : index
    %c0_36 = arith.constant 0 : index
    %72 = vector.load %arg6[%c0_34, %c0_35, %c0_36] : memref<2x1x128xf32, #tpu.memory_space<vmem>>, vector<1x1x128xf32>
    %73 = vector.shape_cast %72 : vector<1x1x128xf32> to vector<1x128xf32>
    %74 = vector.broadcast %73 : vector<1x128xf32> to vector<16x128xf32>
    %75 = arith.addf %71, %74 : vector<16x128xf32>
    %76 = vector.extract_strided_slice %75 {offsets = [0, 0], sizes = [16, 64], strides = [1, 1]} : vector<16x128xf32> to vector<16x64xf32>
    %77 = vector.extract_strided_slice %75 {offsets = [0, 64], sizes = [16, 64], strides = [1, 1]} : vector<16x128xf32> to vector<16x64xf32>
    %78 = arith.negf %77 : vector<16x64xf32>
    %79 = math.exp %78 : vector<16x64xf32>
    %cst_37 = arith.constant 1.000000e+00 : f32
    %80 = vector.broadcast %cst_37 : f32 to vector<16x64xf32>
    %81 = arith.addf %80, %79 : vector<16x64xf32>
    %82 = arith.divf %80, %81 : vector<16x64xf32>
    %83 = arith.mulf %76, %82 : vector<16x64xf32>
    %84 = arith.addf %83, %49 : vector<16x64xf32>
    %cst_38 = arith.constant 0.707106769 : f32
    %85 = vector.broadcast %cst_38 : f32 to vector<16x64xf32>
    %86 = arith.mulf %84, %85 : vector<16x64xf32>
    %cst_39 = arith.constant 0.000000e+00 : f32
    %87 = vector.broadcast %cst_39 : f32 to vector<16x128xf32>
    %c1_i32_40 = arith.constant 1 : i32
    %88 = tpu.dynamic_rotate %86 by %c1_i32_40 dim 0 : vector<16x64xf32>, i32 -> vector<16x64xf32>
    %cst_41 = arith.constant 0.000000e+00 : f32
    %89 = vector.broadcast %cst_41 : f32 to vector<16x64xf32>
    %90 = arith.select %18, %88, %89 : vector<16x64xi1>, vector<16x64xf32>
    %91 = arith.truncf %90 : vector<16x64xf32> to vector<16x64xbf16>
    %c1_42 = arith.constant 1 : index
    %c0_43 = arith.constant 0 : index
    %c0_44 = arith.constant 0 : index
    %c0_45 = arith.constant 0 : index
    %92 = vector.load %arg5[%c1_42, %c0_43, %c0_44, %c0_45] : memref<2x3x64x128xbf16, #tpu.memory_space<vmem>>, vector<1x1x64x128xbf16>
    %93 = vector.shape_cast %92 : vector<1x1x64x128xbf16> to vector<64x128xbf16>
    %cst_46 = arith.constant dense<0.000000e+00> : vector<16x128xf32>
    %94 = tpu.matmul %91, %93, %cst_46 {dimension_numbers = #tpu.dot_dimension_numbers<[1], [0], [0], [1], [0, 0, 1, 1], [], []>} : vector<16x64xbf16>, vector<64x128xbf16>, vector<16x128xf32> -> vector<16x128xf32>
    %95 = arith.addf %87, %94 : vector<16x128xf32>
    %96 = arith.truncf %86 : vector<16x64xf32> to vector<16x64xbf16>
    %c1_47 = arith.constant 1 : index
    %c1_48 = arith.constant 1 : index
    %c0_49 = arith.constant 0 : index
    %c0_50 = arith.constant 0 : index
    %97 = vector.load %arg5[%c1_47, %c1_48, %c0_49, %c0_50] : memref<2x3x64x128xbf16, #tpu.memory_space<vmem>>, vector<1x1x64x128xbf16>
    %98 = vector.shape_cast %97 : vector<1x1x64x128xbf16> to vector<64x128xbf16>
    %cst_51 = arith.constant dense<0.000000e+00> : vector<16x128xf32>
    %99 = tpu.matmul %96, %98, %cst_51 {dimension_numbers = #tpu.dot_dimension_numbers<[1], [0], [0], [1], [0, 0, 1, 1], [], []>} : vector<16x64xbf16>, vector<64x128xbf16>, vector<16x128xf32> -> vector<16x128xf32>
    %100 = arith.addf %95, %99 : vector<16x128xf32>
    %c15_i32_52 = arith.constant 15 : i32
    %101 = tpu.dynamic_rotate %86 by %c15_i32_52 dim 0 : vector<16x64xf32>, i32 -> vector<16x64xf32>
    %cst_53 = arith.constant 0.000000e+00 : f32
    %102 = vector.broadcast %cst_53 : f32 to vector<16x64xf32>
    %103 = arith.select %20, %101, %102 : vector<16x64xi1>, vector<16x64xf32>
    %104 = arith.truncf %103 : vector<16x64xf32> to vector<16x64xbf16>
    %c1_54 = arith.constant 1 : index
    %c2_55 = arith.constant 2 : index
    %c0_56 = arith.constant 0 : index
    %c0_57 = arith.constant 0 : index
    %105 = vector.load %arg5[%c1_54, %c2_55, %c0_56, %c0_57] : memref<2x3x64x128xbf16, #tpu.memory_space<vmem>>, vector<1x1x64x128xbf16>
    %106 = vector.shape_cast %105 : vector<1x1x64x128xbf16> to vector<64x128xbf16>
    %cst_58 = arith.constant dense<0.000000e+00> : vector<16x128xf32>
    %107 = tpu.matmul %104, %106, %cst_58 {dimension_numbers = #tpu.dot_dimension_numbers<[1], [0], [0], [1], [0, 0, 1, 1], [], []>} : vector<16x64xbf16>, vector<64x128xbf16>, vector<16x128xf32> -> vector<16x128xf32>
    %108 = arith.addf %100, %107 : vector<16x128xf32>
    %c1_59 = arith.constant 1 : index
    %c0_60 = arith.constant 0 : index
    %c0_61 = arith.constant 0 : index
    %109 = vector.load %arg6[%c1_59, %c0_60, %c0_61] : memref<2x1x128xf32, #tpu.memory_space<vmem>>, vector<1x1x128xf32>
    %110 = vector.shape_cast %109 : vector<1x1x128xf32> to vector<1x128xf32>
    %111 = vector.broadcast %110 : vector<1x128xf32> to vector<16x128xf32>
    %112 = arith.addf %108, %111 : vector<16x128xf32>
    %113 = vector.extract_strided_slice %112 {offsets = [0, 0], sizes = [16, 64], strides = [1, 1]} : vector<16x128xf32> to vector<16x64xf32>
    %114 = vector.extract_strided_slice %112 {offsets = [0, 64], sizes = [16, 64], strides = [1, 1]} : vector<16x128xf32> to vector<16x64xf32>
    %115 = arith.negf %114 : vector<16x64xf32>
    %116 = math.exp %115 : vector<16x64xf32>
    %cst_62 = arith.constant 1.000000e+00 : f32
    %117 = vector.broadcast %cst_62 : f32 to vector<16x64xf32>
    %118 = arith.addf %117, %116 : vector<16x64xf32>
    %119 = arith.divf %117, %118 : vector<16x64xf32>
    %120 = arith.mulf %113, %119 : vector<16x64xf32>
    %121 = arith.addf %120, %86 : vector<16x64xf32>
    %cst_63 = arith.constant 0.707106769 : f32
    %122 = vector.broadcast %cst_63 : f32 to vector<16x64xf32>
    %123 = arith.mulf %121, %122 : vector<16x64xf32>
    %124 = arith.truncf %123 : vector<16x64xf32> to vector<16x64xbf16>
    %c0_64 = arith.constant 0 : index
    %c0_65 = arith.constant 0 : index
    %125 = vector.load %arg7[%c0_64, %c0_65] : memref<64x32xbf16, #tpu.memory_space<vmem>>, vector<64x32xbf16>
    %cst_66 = arith.constant dense<0.000000e+00> : vector<16x32xf32>
    %126 = tpu.matmul %124, %125, %cst_66 {dimension_numbers = #tpu.dot_dimension_numbers<[1], [0], [0], [1], [0, 0, 1, 1], [], []>} : vector<16x64xbf16>, vector<64x32xbf16>, vector<16x32xf32> -> vector<16x32xf32>
    %c0_67 = arith.constant 0 : index
    %c0_68 = arith.constant 0 : index
    %127 = vector.load %arg8[%c0_67, %c0_68] : memref<1x32xf32, #tpu.memory_space<vmem>>, vector<1x32xf32>
    %128 = vector.broadcast %127 : vector<1x32xf32> to vector<16x32xf32>
    %129 = arith.addf %126, %128 : vector<16x32xf32>
    %130 = arith.addf %129, %43 : vector<16x32xf32>
    %cst_69 = arith.constant 0.707106769 : f32
    %131 = vector.broadcast %cst_69 : f32 to vector<16x32xf32>
    %132 = arith.mulf %130, %131 : vector<16x32xf32>
    %133 = vector.shape_cast %129 : vector<16x32xf32> to vector<2x8x32xf32>
    %134 = vector.shape_cast %132 : vector<16x32xf32> to vector<2x8x32xf32>
    %cst_70 = arith.constant 0.000000e+00 : f32
    %135 = vector.broadcast %cst_70 : f32 to vector<2x120x32xf32>
    %136 = tpu.concatenate %133, %135 in 1 : vector<2x8x32xf32>, vector<2x120x32xf32> -> vector<2x128x32xf32>
    %137 = tpu.concatenate %134, %135 in 1 : vector<2x8x32xf32>, vector<2x120x32xf32> -> vector<2x128x32xf32>
    %138 = tpu.iota {dimensions = array<i32: 2>} : vector<2x8x128xi32>
    %c8_i32_71 = arith.constant 8 : i32
    %139 = vector.broadcast %c8_i32_71 : i32 to vector<2x8x128xi32>
    %140 = arith.cmpi slt, %138, %139 : vector<2x8x128xi32>
    %141 = arith.truncf %137 : vector<2x128x32xf32> to vector<2x128x32xbf16>
    %c0_72 = arith.constant 0 : index
    %c0_73 = arith.constant 0 : index
    %142 = vector.load %arg14[%c0_72, %c0_73] : memref<1x32xf32, #tpu.memory_space<vmem>>, vector<1x32xf32>
    %143 = vector.shape_cast %142 : vector<1x32xf32> to vector<1x32xf32>
    %144 = vector.broadcast %143 : vector<1x32xf32> to vector<16x32xf32>
    %c0_74 = arith.constant 0 : index
    %c0_75 = arith.constant 0 : index
    %145 = vector.load %arg16[%c0_74, %c0_75] : memref<1x64xf32, #tpu.memory_space<vmem>>, vector<1x64xf32>
    %146 = vector.shape_cast %145 : vector<1x64xf32> to vector<1x64xf32>
    %147 = vector.broadcast %146 : vector<1x64xf32> to vector<16x64xf32>
    %c0_76 = arith.constant 0 : index
    %c0_77 = arith.constant 0 : index
    %c0_78 = arith.constant 0 : index
    %148 = vector.load %arg2[%c0_76, %c0_77, %c0_78] : memref<2x8x32xf32, #tpu.memory_space<vmem>>, vector<2x8x32xf32>
    %149 = vector.shape_cast %148 : vector<2x8x32xf32> to vector<16x32xf32>
    %150 = arith.truncf %149 : vector<16x32xf32> to vector<16x32xbf16>
    %c0_79 = arith.constant 0 : index
    %c0_80 = arith.constant 0 : index
    %151 = vector.load %arg9[%c0_79, %c0_80] : memref<32x64xbf16, #tpu.memory_space<vmem>>, vector<32x64xbf16>
    %cst_81 = arith.constant dense<0.000000e+00> : vector<16x64xf32>
    %152 = tpu.matmul %150, %151, %cst_81 {dimension_numbers = #tpu.dot_dimension_numbers<[1], [0], [0], [1], [0, 0, 1, 1], [], []>} : vector<16x32xbf16>, vector<32x64xbf16>, vector<16x64xf32> -> vector<16x64xf32>
    %c0_82 = arith.constant 0 : index
    %c0_83 = arith.constant 0 : index
    %153 = vector.load %arg10[%c0_82, %c0_83] : memref<1x64xf32, #tpu.memory_space<vmem>>, vector<1x64xf32>
    %154 = vector.broadcast %153 : vector<1x64xf32> to vector<16x64xf32>
    %155 = arith.addf %152, %154 : vector<16x64xf32>
    %cst_84 = arith.constant 0.000000e+00 : f32
    %156 = vector.broadcast %cst_84 : f32 to vector<16x128xf32>
    %c2_i32_85 = arith.constant 2 : i32
    %157 = tpu.dynamic_rotate %155 by %c2_i32_85 dim 0 : vector<16x64xf32>, i32 -> vector<16x64xf32>
    %cst_86 = arith.constant 0.000000e+00 : f32
    %158 = vector.broadcast %cst_86 : f32 to vector<16x64xf32>
    %159 = arith.select %39, %157, %158 : vector<16x64xi1>, vector<16x64xf32>
    %160 = arith.truncf %159 : vector<16x64xf32> to vector<16x64xbf16>
    %c0_87 = arith.constant 0 : index
    %c0_88 = arith.constant 0 : index
    %c0_89 = arith.constant 0 : index
    %c0_90 = arith.constant 0 : index
    %161 = vector.load %arg11[%c0_87, %c0_88, %c0_89, %c0_90] : memref<2x3x64x128xbf16, #tpu.memory_space<vmem>>, vector<1x1x64x128xbf16>
    %162 = vector.shape_cast %161 : vector<1x1x64x128xbf16> to vector<64x128xbf16>
    %cst_91 = arith.constant dense<0.000000e+00> : vector<16x128xf32>
    %163 = tpu.matmul %160, %162, %cst_91 {dimension_numbers = #tpu.dot_dimension_numbers<[1], [0], [0], [1], [0, 0, 1, 1], [], []>} : vector<16x64xbf16>, vector<64x128xbf16>, vector<16x128xf32> -> vector<16x128xf32>
    %164 = arith.addf %156, %163 : vector<16x128xf32>
    %c1_i32_92 = arith.constant 1 : i32
    %165 = tpu.dynamic_rotate %155 by %c1_i32_92 dim 0 : vector<16x64xf32>, i32 -> vector<16x64xf32>
    %cst_93 = arith.constant 0.000000e+00 : f32
    %166 = vector.broadcast %cst_93 : f32 to vector<16x64xf32>
    %167 = arith.select %41, %165, %166 : vector<16x64xi1>, vector<16x64xf32>
    %168 = arith.truncf %167 : vector<16x64xf32> to vector<16x64xbf16>
    %c0_94 = arith.constant 0 : index
    %c1_95 = arith.constant 1 : index
    %c0_96 = arith.constant 0 : index
    %c0_97 = arith.constant 0 : index
    %169 = vector.load %arg11[%c0_94, %c1_95, %c0_96, %c0_97] : memref<2x3x64x128xbf16, #tpu.memory_space<vmem>>, vector<1x1x64x128xbf16>
    %170 = vector.shape_cast %169 : vector<1x1x64x128xbf16> to vector<64x128xbf16>
    %cst_98 = arith.constant dense<0.000000e+00> : vector<16x128xf32>
    %171 = tpu.matmul %168, %170, %cst_98 {dimension_numbers = #tpu.dot_dimension_numbers<[1], [0], [0], [1], [0, 0, 1, 1], [], []>} : vector<16x64xbf16>, vector<64x128xbf16>, vector<16x128xf32> -> vector<16x128xf32>
    %172 = arith.addf %164, %171 : vector<16x128xf32>
    %173 = arith.truncf %155 : vector<16x64xf32> to vector<16x64xbf16>
    %c0_99 = arith.constant 0 : index
    %c2_100 = arith.constant 2 : index
    %c0_101 = arith.constant 0 : index
    %c0_102 = arith.constant 0 : index
    %174 = vector.load %arg11[%c0_99, %c2_100, %c0_101, %c0_102] : memref<2x3x64x128xbf16, #tpu.memory_space<vmem>>, vector<1x1x64x128xbf16>
    %175 = vector.shape_cast %174 : vector<1x1x64x128xbf16> to vector<64x128xbf16>
    %cst_103 = arith.constant dense<0.000000e+00> : vector<16x128xf32>
    %176 = tpu.matmul %173, %175, %cst_103 {dimension_numbers = #tpu.dot_dimension_numbers<[1], [0], [0], [1], [0, 0, 1, 1], [], []>} : vector<16x64xbf16>, vector<64x128xbf16>, vector<16x128xf32> -> vector<16x128xf32>
    %177 = arith.addf %172, %176 : vector<16x128xf32>
    %c0_104 = arith.constant 0 : index
    %c0_105 = arith.constant 0 : index
    %c0_106 = arith.constant 0 : index
    %178 = vector.load %arg12[%c0_104, %c0_105, %c0_106] : memref<2x1x128xf32, #tpu.memory_space<vmem>>, vector<1x1x128xf32>
    %179 = vector.shape_cast %178 : vector<1x1x128xf32> to vector<1x128xf32>
    %180 = vector.broadcast %179 : vector<1x128xf32> to vector<16x128xf32>
    %181 = arith.addf %177, %180 : vector<16x128xf32>
    %182 = vector.extract_strided_slice %181 {offsets = [0, 0], sizes = [16, 64], strides = [1, 1]} : vector<16x128xf32> to vector<16x64xf32>
    %183 = vector.extract_strided_slice %181 {offsets = [0, 64], sizes = [16, 64], strides = [1, 1]} : vector<16x128xf32> to vector<16x64xf32>
    %184 = arith.negf %183 : vector<16x64xf32>
    %185 = math.exp %184 : vector<16x64xf32>
    %cst_107 = arith.constant 1.000000e+00 : f32
    %186 = vector.broadcast %cst_107 : f32 to vector<16x64xf32>
    %187 = arith.addf %186, %185 : vector<16x64xf32>
    %188 = arith.divf %186, %187 : vector<16x64xf32>
    %189 = arith.mulf %182, %188 : vector<16x64xf32>
    %190 = arith.truncf %189 : vector<16x64xf32> to vector<16x64xbf16>
    %c0_108 = arith.constant 0 : index
    %c0_109 = arith.constant 0 : index
    %191 = vector.load %arg13[%c0_108, %c0_109] : memref<64x32xbf16, #tpu.memory_space<vmem>>, vector<64x32xbf16>
    %cst_110 = arith.constant dense<0.000000e+00> : vector<16x32xf32>
    %192 = tpu.matmul %190, %191, %cst_110 {dimension_numbers = #tpu.dot_dimension_numbers<[1], [0], [0], [1], [0, 0, 1, 1], [], []>} : vector<16x64xbf16>, vector<64x32xbf16>, vector<16x32xf32> -> vector<16x32xf32>
    %193 = arith.addf %192, %144 : vector<16x32xf32>
    %194 = arith.addf %193, %149 : vector<16x32xf32>
    %cst_111 = arith.constant 0.707106769 : f32
    %195 = vector.broadcast %cst_111 : f32 to vector<16x32xf32>
    %196 = arith.mulf %194, %195 : vector<16x32xf32>
    %197 = vector.shape_cast %196 : vector<16x32xf32> to vector<2x8x32xf32>
    "tpu.trace_start"() <{level = 10 : i32, message = "bqe,bke->bqk"}> : () -> ()
    %cst_112 = arith.constant dense<0.000000e+00> : vector<2x8x128xf32>
    %198 = tpu.matmul %197, %136, %cst_112 {dimension_numbers = #tpu.dot_dimension_numbers<[2], [2], [1], [1], [0, 0, 0, 1, 1, 1], [0], [0]>} : vector<2x8x32xf32>, vector<2x128x32xf32>, vector<2x8x128xf32> -> vector<2x8x128xf32>
    %cst_113 = arith.constant -1.000000e+30 : f32
    "tpu.trace_stop"() : () -> ()
    %199 = vector.broadcast %cst_113 : f32 to vector<2x8x128xf32>
    %200 = arith.select %140, %198, %199 : vector<2x8x128xi1>, vector<2x8x128xf32>
    %cst_114 = arith.constant dense<0xFF800000> : vector<2x8xf32>
    %201 = vector.multi_reduction <maximumf>, %200, %cst_114 [2] : vector<2x8x128xf32> to vector<2x8xf32>
    %202 = vector.shape_cast %201 : vector<2x8xf32> to vector<2x8x1xf32>
    %203 = vector.broadcast %202 : vector<2x8x1xf32> to vector<2x8x128xf32>
    %204 = arith.subf %200, %203 : vector<2x8x128xf32>
    %205 = math.exp %204 : vector<2x8x128xf32>
    %cst_115 = arith.constant dense<0.000000e+00> : vector<2x8xf32>
    %206 = vector.multi_reduction <add>, %205, %cst_115 [2] : vector<2x8x128xf32> to vector<2x8xf32>
    %207 = vector.shape_cast %206 : vector<2x8xf32> to vector<2x8x1xf32>
    %208 = tpu.reciprocal %207 : vector<2x8x1xf32> -> vector<2x8x1xf32>
    %209 = vector.broadcast %208 : vector<2x8x1xf32> to vector<2x8x128xf32>
    %210 = arith.mulf %205, %209 : vector<2x8x128xf32>
    %211 = arith.truncf %210 : vector<2x8x128xf32> to vector<2x8x128xbf16>
    "tpu.trace_start"() <{level = 10 : i32, message = "bqk,bke->bqe"}> : () -> ()
    %cst_116 = arith.constant dense<0.000000e+00> : vector<2x8x32xf32>
    %212 = tpu.matmul %211, %141, %cst_116 {dimension_numbers = #tpu.dot_dimension_numbers<[2], [1], [1], [2], [0, 0, 0, 1, 1, 2], [0], [0]>} : vector<2x8x128xbf16>, vector<2x128x32xbf16>, vector<2x8x32xf32> -> vector<2x8x32xf32>
    "tpu.trace_stop"() : () -> ()
    %213 = vector.shape_cast %212 : vector<2x8x32xf32> to vector<16x32xf32>
    %214 = arith.truncf %213 : vector<16x32xf32> to vector<16x32xbf16>
    %c0_117 = arith.constant 0 : index
    %c0_118 = arith.constant 0 : index
    %215 = vector.load %arg15[%c0_117, %c0_118] : memref<32x64xbf16, #tpu.memory_space<vmem>>, vector<32x64xbf16>
    %cst_119 = arith.constant dense<0.000000e+00> : vector<16x64xf32>
    %216 = tpu.matmul %214, %215, %cst_119 {dimension_numbers = #tpu.dot_dimension_numbers<[1], [0], [0], [1], [0, 0, 1, 1], [], []>} : vector<16x32xbf16>, vector<32x64xbf16>, vector<16x64xf32> -> vector<16x64xf32>
    %217 = arith.addf %216, %147 : vector<16x64xf32>
    %218 = arith.addf %189, %217 : vector<16x64xf32>
    %cst_120 = arith.constant 0.707106769 : f32
    %219 = vector.broadcast %cst_120 : f32 to vector<16x64xf32>
    %220 = arith.mulf %218, %219 : vector<16x64xf32>
    %221 = arith.addf %220, %155 : vector<16x64xf32>
    %cst_121 = arith.constant 0.707106769 : f32
    %222 = vector.broadcast %cst_121 : f32 to vector<16x64xf32>
    %223 = arith.mulf %221, %222 : vector<16x64xf32>
    %cst_122 = arith.constant 0.000000e+00 : f32
    %224 = vector.broadcast %cst_122 : f32 to vector<16x128xf32>
    %c2_i32_123 = arith.constant 2 : i32
    %225 = tpu.dynamic_rotate %223 by %c2_i32_123 dim 0 : vector<16x64xf32>, i32 -> vector<16x64xf32>
    %cst_124 = arith.constant 0.000000e+00 : f32
    %226 = vector.broadcast %cst_124 : f32 to vector<16x64xf32>
    %227 = arith.select %39, %225, %226 : vector<16x64xi1>, vector<16x64xf32>
    %228 = arith.truncf %227 : vector<16x64xf32> to vector<16x64xbf16>
    %c1_125 = arith.constant 1 : index
    %c0_126 = arith.constant 0 : index
    %c0_127 = arith.constant 0 : index
    %c0_128 = arith.constant 0 : index
    %229 = vector.load %arg11[%c1_125, %c0_126, %c0_127, %c0_128] : memref<2x3x64x128xbf16, #tpu.memory_space<vmem>>, vector<1x1x64x128xbf16>
    %230 = vector.shape_cast %229 : vector<1x1x64x128xbf16> to vector<64x128xbf16>
    %cst_129 = arith.constant dense<0.000000e+00> : vector<16x128xf32>
    %231 = tpu.matmul %228, %230, %cst_129 {dimension_numbers = #tpu.dot_dimension_numbers<[1], [0], [0], [1], [0, 0, 1, 1], [], []>} : vector<16x64xbf16>, vector<64x128xbf16>, vector<16x128xf32> -> vector<16x128xf32>
    %232 = arith.addf %224, %231 : vector<16x128xf32>
    %c1_i32_130 = arith.constant 1 : i32
    %233 = tpu.dynamic_rotate %223 by %c1_i32_130 dim 0 : vector<16x64xf32>, i32 -> vector<16x64xf32>
    %cst_131 = arith.constant 0.000000e+00 : f32
    %234 = vector.broadcast %cst_131 : f32 to vector<16x64xf32>
    %235 = arith.select %41, %233, %234 : vector<16x64xi1>, vector<16x64xf32>
    %236 = arith.truncf %235 : vector<16x64xf32> to vector<16x64xbf16>
    %c1_132 = arith.constant 1 : index
    %c1_133 = arith.constant 1 : index
    %c0_134 = arith.constant 0 : index
    %c0_135 = arith.constant 0 : index
    %237 = vector.load %arg11[%c1_132, %c1_133, %c0_134, %c0_135] : memref<2x3x64x128xbf16, #tpu.memory_space<vmem>>, vector<1x1x64x128xbf16>
    %238 = vector.shape_cast %237 : vector<1x1x64x128xbf16> to vector<64x128xbf16>
    %cst_136 = arith.constant dense<0.000000e+00> : vector<16x128xf32>
    %239 = tpu.matmul %236, %238, %cst_136 {dimension_numbers = #tpu.dot_dimension_numbers<[1], [0], [0], [1], [0, 0, 1, 1], [], []>} : vector<16x64xbf16>, vector<64x128xbf16>, vector<16x128xf32> -> vector<16x128xf32>
    %240 = arith.addf %232, %239 : vector<16x128xf32>
    %241 = arith.truncf %223 : vector<16x64xf32> to vector<16x64xbf16>
    %c1_137 = arith.constant 1 : index
    %c2_138 = arith.constant 2 : index
    %c0_139 = arith.constant 0 : index
    %c0_140 = arith.constant 0 : index
    %242 = vector.load %arg11[%c1_137, %c2_138, %c0_139, %c0_140] : memref<2x3x64x128xbf16, #tpu.memory_space<vmem>>, vector<1x1x64x128xbf16>
    %243 = vector.shape_cast %242 : vector<1x1x64x128xbf16> to vector<64x128xbf16>
    %cst_141 = arith.constant dense<0.000000e+00> : vector<16x128xf32>
    %244 = tpu.matmul %241, %243, %cst_141 {dimension_numbers = #tpu.dot_dimension_numbers<[1], [0], [0], [1], [0, 0, 1, 1], [], []>} : vector<16x64xbf16>, vector<64x128xbf16>, vector<16x128xf32> -> vector<16x128xf32>
    %245 = arith.addf %240, %244 : vector<16x128xf32>
    %c1_142 = arith.constant 1 : index
    %c0_143 = arith.constant 0 : index
    %c0_144 = arith.constant 0 : index
    %246 = vector.load %arg12[%c1_142, %c0_143, %c0_144] : memref<2x1x128xf32, #tpu.memory_space<vmem>>, vector<1x1x128xf32>
    %247 = vector.shape_cast %246 : vector<1x1x128xf32> to vector<1x128xf32>
    %248 = vector.broadcast %247 : vector<1x128xf32> to vector<16x128xf32>
    %249 = arith.addf %245, %248 : vector<16x128xf32>
    %250 = vector.extract_strided_slice %249 {offsets = [0, 0], sizes = [16, 64], strides = [1, 1]} : vector<16x128xf32> to vector<16x64xf32>
    %251 = vector.extract_strided_slice %249 {offsets = [0, 64], sizes = [16, 64], strides = [1, 1]} : vector<16x128xf32> to vector<16x64xf32>
    %252 = arith.negf %251 : vector<16x64xf32>
    %253 = math.exp %252 : vector<16x64xf32>
    %cst_145 = arith.constant 1.000000e+00 : f32
    %254 = vector.broadcast %cst_145 : f32 to vector<16x64xf32>
    %255 = arith.addf %254, %253 : vector<16x64xf32>
    %256 = arith.divf %254, %255 : vector<16x64xf32>
    %257 = arith.mulf %250, %256 : vector<16x64xf32>
    %258 = arith.truncf %257 : vector<16x64xf32> to vector<16x64xbf16>
    %c0_146 = arith.constant 0 : index
    %c0_147 = arith.constant 0 : index
    %259 = vector.load %arg13[%c0_146, %c0_147] : memref<64x32xbf16, #tpu.memory_space<vmem>>, vector<64x32xbf16>
    %cst_148 = arith.constant dense<0.000000e+00> : vector<16x32xf32>
    %260 = tpu.matmul %258, %259, %cst_148 {dimension_numbers = #tpu.dot_dimension_numbers<[1], [0], [0], [1], [0, 0, 1, 1], [], []>} : vector<16x64xbf16>, vector<64x32xbf16>, vector<16x32xf32> -> vector<16x32xf32>
    %261 = arith.addf %260, %144 : vector<16x32xf32>
    %262 = arith.addf %261, %149 : vector<16x32xf32>
    %cst_149 = arith.constant 0.707106769 : f32
    %263 = vector.broadcast %cst_149 : f32 to vector<16x32xf32>
    %264 = arith.mulf %262, %263 : vector<16x32xf32>
    %265 = vector.shape_cast %264 : vector<16x32xf32> to vector<2x8x32xf32>
    "tpu.trace_start"() <{level = 10 : i32, message = "bqe,bke->bqk"}> : () -> ()
    %cst_150 = arith.constant dense<0.000000e+00> : vector<2x8x128xf32>
    %266 = tpu.matmul %265, %136, %cst_150 {dimension_numbers = #tpu.dot_dimension_numbers<[2], [2], [1], [1], [0, 0, 0, 1, 1, 1], [0], [0]>} : vector<2x8x32xf32>, vector<2x128x32xf32>, vector<2x8x128xf32> -> vector<2x8x128xf32>
    %cst_151 = arith.constant -1.000000e+30 : f32
    "tpu.trace_stop"() : () -> ()
    %267 = vector.broadcast %cst_151 : f32 to vector<2x8x128xf32>
    %268 = arith.select %140, %266, %267 : vector<2x8x128xi1>, vector<2x8x128xf32>
    %cst_152 = arith.constant dense<0xFF800000> : vector<2x8xf32>
    %269 = vector.multi_reduction <maximumf>, %268, %cst_152 [2] : vector<2x8x128xf32> to vector<2x8xf32>
    %270 = vector.shape_cast %269 : vector<2x8xf32> to vector<2x8x1xf32>
    %271 = vector.broadcast %270 : vector<2x8x1xf32> to vector<2x8x128xf32>
    %272 = arith.subf %268, %271 : vector<2x8x128xf32>
    %273 = math.exp %272 : vector<2x8x128xf32>
    %cst_153 = arith.constant dense<0.000000e+00> : vector<2x8xf32>
    %274 = vector.multi_reduction <add>, %273, %cst_153 [2] : vector<2x8x128xf32> to vector<2x8xf32>
    %275 = vector.shape_cast %274 : vector<2x8xf32> to vector<2x8x1xf32>
    %276 = tpu.reciprocal %275 : vector<2x8x1xf32> -> vector<2x8x1xf32>
    %277 = vector.broadcast %276 : vector<2x8x1xf32> to vector<2x8x128xf32>
    %278 = arith.mulf %273, %277 : vector<2x8x128xf32>
    %279 = arith.truncf %278 : vector<2x8x128xf32> to vector<2x8x128xbf16>
    "tpu.trace_start"() <{level = 10 : i32, message = "bqk,bke->bqe"}> : () -> ()
    %cst_154 = arith.constant dense<0.000000e+00> : vector<2x8x32xf32>
    %280 = tpu.matmul %279, %141, %cst_154 {dimension_numbers = #tpu.dot_dimension_numbers<[2], [1], [1], [2], [0, 0, 0, 1, 1, 2], [0], [0]>} : vector<2x8x128xbf16>, vector<2x128x32xbf16>, vector<2x8x32xf32> -> vector<2x8x32xf32>
    "tpu.trace_stop"() : () -> ()
    %281 = vector.shape_cast %280 : vector<2x8x32xf32> to vector<16x32xf32>
    %282 = arith.truncf %281 : vector<16x32xf32> to vector<16x32xbf16>
    %c0_155 = arith.constant 0 : index
    %c0_156 = arith.constant 0 : index
    %283 = vector.load %arg15[%c0_155, %c0_156] : memref<32x64xbf16, #tpu.memory_space<vmem>>, vector<32x64xbf16>
    %cst_157 = arith.constant dense<0.000000e+00> : vector<16x64xf32>
    %284 = tpu.matmul %282, %283, %cst_157 {dimension_numbers = #tpu.dot_dimension_numbers<[1], [0], [0], [1], [0, 0, 1, 1], [], []>} : vector<16x32xbf16>, vector<32x64xbf16>, vector<16x64xf32> -> vector<16x64xf32>
    %285 = arith.addf %284, %147 : vector<16x64xf32>
    %286 = arith.addf %257, %285 : vector<16x64xf32>
    %cst_158 = arith.constant 0.707106769 : f32
    %287 = vector.broadcast %cst_158 : f32 to vector<16x64xf32>
    %288 = arith.mulf %286, %287 : vector<16x64xf32>
    %289 = arith.addf %288, %223 : vector<16x64xf32>
    %cst_159 = arith.constant 0.707106769 : f32
    %290 = vector.broadcast %cst_159 : f32 to vector<16x64xf32>
    %291 = arith.mulf %289, %290 : vector<16x64xf32>
    %292 = arith.truncf %291 : vector<16x64xf32> to vector<16x64xbf16>
    %c0_160 = arith.constant 0 : index
    %c0_161 = arith.constant 0 : index
    %293 = vector.load %arg17[%c0_160, %c0_161] : memref<64x32xbf16, #tpu.memory_space<vmem>>, vector<64x32xbf16>
    %cst_162 = arith.constant dense<0.000000e+00> : vector<16x32xf32>
    %294 = tpu.matmul %292, %293, %cst_162 {dimension_numbers = #tpu.dot_dimension_numbers<[1], [0], [0], [1], [0, 0, 1, 1], [], []>} : vector<16x64xbf16>, vector<64x32xbf16>, vector<16x32xf32> -> vector<16x32xf32>
    %c0_163 = arith.constant 0 : index
    %c0_164 = arith.constant 0 : index
    %295 = vector.load %arg18[%c0_163, %c0_164] : memref<1x32xf32, #tpu.memory_space<vmem>>, vector<1x32xf32>
    %296 = vector.broadcast %295 : vector<1x32xf32> to vector<16x32xf32>
    %297 = arith.addf %294, %296 : vector<16x32xf32>
    %298 = arith.truncf %297 : vector<16x32xf32> to vector<16x32xbf16>
    %c0_165 = arith.constant 0 : index
    %c0_166 = arith.constant 0 : index
    %299 = vector.load %arg19[%c0_165, %c0_166] : memref<32x128xbf16, #tpu.memory_space<vmem>>, vector<32x128xbf16>
    %cst_167 = arith.constant dense<0.000000e+00> : vector<16x128xf32>
    %300 = tpu.matmul %298, %299, %cst_167 {dimension_numbers = #tpu.dot_dimension_numbers<[1], [0], [0], [1], [0, 0, 1, 1], [], []>} : vector<16x32xbf16>, vector<32x128xbf16>, vector<16x128xf32> -> vector<16x128xf32>
    %c0_168 = arith.constant 0 : index
    %c0_169 = arith.constant 0 : index
    %301 = vector.load %arg20[%c0_168, %c0_169] : memref<1x128xf32, #tpu.memory_space<vmem>>, vector<1x128xf32>
    %302 = vector.broadcast %301 : vector<1x128xf32> to vector<16x128xf32>
    %303 = arith.addf %300, %302 : vector<16x128xf32>
    %304 = vector.shape_cast %303 : vector<16x128xf32> to vector<2x8x128xf32>
    %c0_170 = arith.constant 0 : index
    %c0_171 = arith.constant 0 : index
    %c0_172 = arith.constant 0 : index
    %305 = vector.load %arg21[%c0_170, %c0_171, %c0_172] : memref<2x8x128xf32, #tpu.memory_space<vmem>>, vector<2x8x128xf32>
    tpu.vector_store %arg21[%c0_170, %c0_171, %c0_172], %304 {strides = array<i32>} : memref<2x8x128xf32, #tpu.memory_space<vmem>>, vector<2x8x128xf32>,
    %c0_173 = arith.constant 0 : index
    %c0_174 = arith.constant 0 : index
    %c0_175 = arith.constant 0 : index
    %306 = vector.load %arg22[%c0_173, %c0_174, %c0_175] : memref<2x8x128xf32, #tpu.memory_space<vmem>>, vector<2x8x128xf32>
    tpu.vector_store %arg22[%c0_173, %c0_174, %c0_175], %278 {strides = array<i32>} : memref<2x8x128xf32, #tpu.memory_space<vmem>>, vector<2x8x128xf32>,
    return
  }
  func.func @transform_0(%arg0: i32) -> (i32, i32, i32) {
    %c0_i32 = arith.constant 0 : i32
    %c0_i32_0 = arith.constant 0 : i32
    %c0_i32_1 = arith.constant 0 : i32
    return %arg0, %c0_i32, %c0_i32_0 : i32, i32, i32
  }
  func.func @transform_1(%arg0: i32) -> (i32, i32, i32) {
    %c0_i32 = arith.constant 0 : i32
    %c0_i32_0 = arith.constant 0 : i32
    %c0_i32_1 = arith.constant 0 : i32
    return %arg0, %c0_i32, %c0_i32_0 : i32, i32, i32
  }
  func.func @transform_2(%arg0: i32) -> (i32, i32) {
    %c0_i32 = arith.constant 0 : i32
    %c0_i32_0 = arith.constant 0 : i32
    %c0_i32_1 = arith.constant 0 : i32
    return %c0_i32, %c0_i32_0 : i32, i32
  }
  func.func @transform_3(%arg0: i32) -> (i32, i32) {
    %c0_i32 = arith.constant 0 : i32
    %c0_i32_0 = arith.constant 0 : i32
    %c0_i32_1 = arith.constant 0 : i32
    return %c0_i32, %c0_i32_0 : i32, i32
  }
  func.func @transform_4(%arg0: i32) -> (i32, i32, i32, i32) {
    %c0_i32 = arith.constant 0 : i32
    %c0_i32_0 = arith.constant 0 : i32
    %c0_i32_1 = arith.constant 0 : i32
    %c0_i32_2 = arith.constant 0 : i32
    %c0_i32_3 = arith.constant 0 : i32
    return %c0_i32, %c0_i32_0, %c0_i32_1, %c0_i32_2 : i32, i32, i32, i32
  }
  func.func @transform_5(%arg0: i32) -> (i32, i32, i32) {
    %c0_i32 = arith.constant 0 : i32
    %c0_i32_0 = arith.constant 0 : i32
    %c0_i32_1 = arith.constant 0 : i32
    %c0_i32_2 = arith.constant 0 : i32
    return %c0_i32, %c0_i32_0, %c0_i32_1 : i32, i32, i32
  }
  func.func @transform_6(%arg0: i32) -> (i32, i32) {
    %c0_i32 = arith.constant 0 : i32
    %c0_i32_0 = arith.constant 0 : i32
    %c0_i32_1 = arith.constant 0 : i32
    return %c0_i32, %c0_i32_0 : i32, i32
  }
  func.func @transform_7(%arg0: i32) -> (i32, i32) {
    %c0_i32 = arith.constant 0 : i32
    %c0_i32_0 = arith.constant 0 : i32
    %c0_i32_1 = arith.constant 0 : i32
    return %c0_i32, %c0_i32_0 : i32, i32
  }
  func.func @transform_8(%arg0: i32) -> (i32, i32) {
    %c0_i32 = arith.constant 0 : i32
    %c0_i32_0 = arith.constant 0 : i32
    %c0_i32_1 = arith.constant 0 : i32
    return %c0_i32, %c0_i32_0 : i32, i32
  }
  func.func @transform_9(%arg0: i32) -> (i32, i32) {
    %c0_i32 = arith.constant 0 : i32
    %c0_i32_0 = arith.constant 0 : i32
    %c0_i32_1 = arith.constant 0 : i32
    return %c0_i32, %c0_i32_0 : i32, i32
  }
  func.func @transform_10(%arg0: i32) -> (i32, i32, i32, i32) {
    %c0_i32 = arith.constant 0 : i32
    %c0_i32_0 = arith.constant 0 : i32
    %c0_i32_1 = arith.constant 0 : i32
    %c0_i32_2 = arith.constant 0 : i32
    %c0_i32_3 = arith.constant 0 : i32
    return %c0_i32, %c0_i32_0, %c0_i32_1, %c0_i32_2 : i32, i32, i32, i32
  }
  func.func @transform_11(%arg0: i32) -> (i32, i32, i32) {
    %c0_i32 = arith.constant 0 : i32
    %c0_i32_0 = arith.constant 0 : i32
    %c0_i32_1 = arith.constant 0 : i32
    %c0_i32_2 = arith.constant 0 : i32
    return %c0_i32, %c0_i32_0, %c0_i32_1 : i32, i32, i32
  }
  func.func @transform_12(%arg0: i32) -> (i32, i32) {
    %c0_i32 = arith.constant 0 : i32
    %c0_i32_0 = arith.constant 0 : i32
    %c0_i32_1 = arith.constant 0 : i32
    return %c0_i32, %c0_i32_0 : i32, i32
  }
  func.func @transform_13(%arg0: i32) -> (i32, i32) {
    %c0_i32 = arith.constant 0 : i32
    %c0_i32_0 = arith.constant 0 : i32
    %c0_i32_1 = arith.constant 0 : i32
    return %c0_i32, %c0_i32_0 : i32, i32
  }
  func.func @transform_14(%arg0: i32) -> (i32, i32) {
    %c0_i32 = arith.constant 0 : i32
    %c0_i32_0 = arith.constant 0 : i32
    %c0_i32_1 = arith.constant 0 : i32
    return %c0_i32, %c0_i32_0 : i32, i32
  }
  func.func @transform_15(%arg0: i32) -> (i32, i32) {
    %c0_i32 = arith.constant 0 : i32
    %c0_i32_0 = arith.constant 0 : i32
    %c0_i32_1 = arith.constant 0 : i32
    return %c0_i32, %c0_i32_0 : i32, i32
  }
  func.func @transform_16(%arg0: i32) -> (i32, i32) {
    %c0_i32 = arith.constant 0 : i32
    %c0_i32_0 = arith.constant 0 : i32
    %c0_i32_1 = arith.constant 0 : i32
    return %c0_i32, %c0_i32_0 : i32, i32
  }
  func.func @transform_17(%arg0: i32) -> (i32, i32) {
    %c0_i32 = arith.constant 0 : i32
    %c0_i32_0 = arith.constant 0 : i32
    %c0_i32_1 = arith.constant 0 : i32
    return %c0_i32, %c0_i32_0 : i32, i32
  }
  func.func @transform_18(%arg0: i32) -> (i32, i32) {
    %c0_i32 = arith.constant 0 : i32
    %c0_i32_0 = arith.constant 0 : i32
    %c0_i32_1 = arith.constant 0 : i32
    return %c0_i32, %c0_i32_0 : i32, i32
  }
  func.func @transform_19(%arg0: i32) -> (i32, i32) {
    %c0_i32 = arith.constant 0 : i32
    %c0_i32_0 = arith.constant 0 : i32
    %c0_i32_1 = arith.constant 0 : i32
    return %c0_i32, %c0_i32_0 : i32, i32
  }
  func.func @transform_20(%arg0: i32) -> (i32, i32, i32) {
    %c0_i32 = arith.constant 0 : i32
    %c0_i32_0 = arith.constant 0 : i32
    %c0_i32_1 = arith.constant 0 : i32
    return %arg0, %c0_i32, %c0_i32_0 : i32, i32, i32
  }
  func.func @transform_21(%arg0: i32) -> (i32, i32, i32) {
    %c0_i32 = arith.constant 0 : i32
    %c0_i32_0 = arith.constant 0 : i32
    %c0_i32_1 = arith.constant 0 : i32
    return %arg0, %c0_i32, %c0_i32_0 : i32, i32, i32
  }
}

</mosaic_0001>

<bundles_post_ra>
// kernel: tpu_custom_call.1
= control target key start
LH: loop header
LB: loop body
LE: loop exit
PB: predicated region body
PF: predicated region fallthrough
CT: control target
= control target key end

     0   :  { %s2899_s0 = inlined_call_operand.vmem [shape: f32[2,8,32], index: 0, kind: input, shape index: {}]   ;;  %s2900_s1 = inlined_call_operand.vmem [shape: f32[2,8,32], index: 1, kind: input, shape index: {}]   ;;  %s2901_s2 = inlined_call_operand.vmem [shape: bf16[32,64], index: 2, kind: input, shape index: {}]   ;;  %s2902_s3 = inlined_call_operand.vmem [shape: f32[1,64], index: 3, kind: input, shape index: {}]   ;;  %s2903_s4 = inlined_call_operand.hbm [shape: bf16[2,3,64,128], index: 4, kind: input, shape index: {}]   ;;  %s2904_s5 = inlined_call_operand.vmem [shape: f32[2,1,128], index: 5, kind: input, shape index: {}]   ;;  %s2905_s6 = inlined_call_operand.vmem [shape: bf16[64,32], index: 6, kind: input, shape index: {}]   ;;  %s2906_s7 = inlined_call_operand.vmem [shape: f32[1,32], index: 7, kind: input, shape index: {}]   ;;  %s2907_s8 = inlined_call_operand.vmem [shape: bf16[32,64], index: 8, kind: input, shape index: {}]   ;;  %s2908_s9 = inlined_call_operand.vmem [shape: f32[1,64], index: 9, kind: input, shape index: {}]   ;;  %s2909_s10 = inlined_call_operand.hbm [shape: bf16[2,3,64,128], index: 10, kind: input, shape index: {}]   ;;  %s2910_s11 = inlined_call_operand.vmem [shape: f32[2,1,128], index: 11, kind: input, shape index: {}]   ;;  %s2911_s12 = inlined_call_operand.vmem [shape: bf16[64,32], index: 12, kind: input, shape index: {}]   ;;  %s2912_s13 = inlined_call_operand.vmem [shape: f32[1,32], index: 13, kind: input, shape index: {}]   ;;  %s2913_s14 = inlined_call_operand.vmem [shape: bf16[32,64], index: 14, kind: input, shape index: {}]   ;;  %s2914_s15 = inlined_call_operand.vmem [shape: f32[1,64], index: 15, kind: input, shape index: {}]   ;;  %s2915_s16 = inlined_call_operand.vmem [shape: bf16[64,32], index: 16, kind: input, shape index: {}]   ;;  %s2916_s17 = inlined_call_operand.vmem [shape: f32[1,32], index: 17, kind: input, shape index: {}]   ;;  %s2917_s18 = inlined_call_operand.vmem [shape: bf16[32,128], index: 18, kind: input, shape index: {}]   ;;  %s2918_s19 = inlined_call_operand.vmem [shape: f32[1,128], index: 19, kind: input, shape index: {}]   ;;  %s2919_s20 = inlined_call_operand.hbm [shape: f32[2,8,128], index: 20, kind: output, shape index: {0}]   ;;  %s2920_s21 = inlined_call_operand.hbm [shape: f32[2,8,128], index: 21, kind: output, shape index: {1}]  }
   0x1   :  { %2925 = sst [smem:[#allocation14_spill]] %s2899_s0 }
   0x2   :  { %2926 = sst [smem:[#allocation15_spill]] %s2900_s1 }
   0x3   :  { %2927 = sst [smem:[#allocation16_spill]] %s2901_s2 }
   0x4   :  { %2928 = sst [smem:[#allocation17_spill]] %s2902_s3 }
   0x5   :  { %2929 = sst [smem:[#allocation18_spill]] %s2903_s4 }
   0x6   :  { %2930 = sst [smem:[#allocation19_spill]] %s2904_s5 }
   0x7   :  { %27 = vsyncpa [#allocation3], 0 }
   0x8   :  { %28 = vsyncpa [#allocation6], 0 }
   0x9   :  { %29 = vsyncpa [#allocation4], 0 }
   0xa   :  { %30 = vsyncpa [#allocation9], 0  ;;  %s2931_s26 = sld [smem:[#allocation18_spill]]  ;;  %s2352_s3 = smov [#allocation2]  }
   0xb   :  { %s45_s28 = sshll.u32 %s2352_s3, 4  ;;  %s66_s4 = sshll.u32 %s2909_s10, 4  ;;  %s46_s28 = int_to_ptr.vmem [resolvable:$true] %s45_s28  ;;  %s67_s4 = int_to_ptr.hbm [resolvable:$true] %s66_s4 }
   0xc   :  { %s2353_s30 = smov 64   ;;  %s2354_s5 = smov 4  }
   0xd   :  { %s2355_s22 = smov [#allocation5]  }
   0xe   :  { %s68_s23 = sshll.u32 %s2355_s22, 4  ;;  %s69_s23 = int_to_ptr.vmem [resolvable:$true] %s68_s23 }
   0xf   :  { %74 = dma.hbm_to_vmem [thread:$0]  %s67_s4, 3072, %s69_s23, [#allocation6], %s2353_s30, %s2353_s30, %s2354_s5  }
  0x10   :  { %s43_s27 = sshll.u32 %s2931_s26, 4  ;;  %s44_s27 = int_to_ptr.hbm [resolvable:$true] %s43_s27 }
  0x11   :  { %51 = dma.hbm_to_vmem [thread:$0]  %s44_s27, 3072, %s46_s28, [#allocation3], %s2353_s30, %s2353_s30, %s2354_s5  }
  0x12   :  { %2344 = dma.done.wait [#allocation3], 3072  }
  0x13   :  { %2345 = vsyncadd [#allocation3], 4294964224 }
  0x14   :  { %2346 = dma.done.wait [#allocation6], 3072  }
  0x15   :  { %2347 = vsyncadd [#allocation6], 4294964224  ;;  %s2932_s2 = sld [smem:[#allocation16_spill]]  ;;  %v2115_v3 = vld [vmem:[#allocation2 + $0x38] sm:$0xff]  ;;  %vm158_vm0 = vcmask 261120   ;;  %v2114_v6 = vld [vmem:[#allocation2 + $0x30] sm:$0xff]  ;;  %v102_v17 = vlaneseq }
  0x16   :  { %s2933_s3 = sld [smem:[#allocation14_spill]]  ;;  %234 = vmatpush.bf16.msra.mxu1 %v2115_v3  ;;  %v2111_v7 = vld [vmem:[#allocation2 + $0x18] sm:$0xff]  ;;  %v2113_v9 = vld [vmem:[#allocation2 + $0x28] sm:$0xff]  ;;  %v2110_v10 = vld [vmem:[#allocation2 + $0x10] sm:$0xff]  ;;  %vm226_vm1 = vcmask 523264   ;;  %s1752_s29 = sshll.u32 %s2920_s21, 4  ;;  %s1753_s29 = int_to_ptr.hbm [resolvable:$true] %s1752_s29 }
  0x17   :  { %v2119_v8 = vld [vmem:[#allocation2 + $0x58] sm:$0xff]  ;;  %275 = vmatpush.bf16.msra.mxu2 %v2111_v7  ;;  %v2118_v11 = vld [vmem:[#allocation2 + $0x50] sm:$0xff]  ;;  %v2112_v12 = vld [vmem:[#allocation2 + $0x20] sm:$0xff]  ;;  %v2501_v18 = vshrl.u32 %v102_v17, 7  ;;  %s2934_s5 = sld [smem:[#allocation17_spill]] }
  0x18   :  { %333 = vmatpush.bf16.msra.mxu3 %v2119_v8  ;;  %v2109_v13 = vld [vmem:[#allocation2 + $0x8] sm:$0xff]  ;;  %v2108_v15 = vld [vmem:[#allocation2] sm:$0xff]  ;;  %s2935_s1 = sld [smem:[#allocation19_spill]] }
  0x19   :  { %v2117_v14 = vld [vmem:[#allocation2 + $0x48] sm:$0xff]  ;;  %v2116_v16 = vld [vmem:[#allocation2 + $0x40] sm:$0xff]  ;;  %v104_v21 = vadd.s32 8, %v2501_v18  ;;  %v2508_v22 = vand.u32 7, %v2501_v18  ;;  %vm178_vm3 = vcmp.lt.s32.totalorder %v2501_v18, 1  ;;  %vm287_vm4 = vcmp.lt.s32.totalorder %v2501_v18, 7 }
  0x1a   :  { %235 = vmatpush.bf16.msra.mxu1 %v2114_v6 }
  0x1b   :  { %v2107_v0 = vld [vmem:[%s2932_s2 + $0x8] sm:$0xff]  ;;  %v2106_v1 = vld [vmem:[%s2932_s2] sm:$0xff]  ;;  %276 = vmatpush.bf16.msra.mxu2 %v2110_v10  ;;  %v2512_v24 = vand.u32 7, %v104_v21  ;;  %vm129_vm2 = vcmp.ge.s32.totalorder %v2508_v22, 1  ;;  %vm131_vm6 = vcmp.lt.s32.totalorder %v2508_v22, 7  ;;  %v2127_v21 = vld [vmem:[#allocation2 + $0x98] sm:$0xff] }
  0x1c   :  { %v2490_v2 = vld [vmem:[%s2933_s3] sm:$0xff]  ;;  %168 = vmatpush.bf16.msra.mxu0 %v2107_v0  ;;  %v2495_v4 = vld [vmem:[%s2933_s3 + $0x8] sm:$0xff]  ;;  %334 = vmatpush.bf16.msra.mxu3 %v2118_v11  ;;  %s2936_s3 = sld [smem:[#allocation15_spill]] }
  0x1d   :  { %v137_v5 = vpack.c.bf16 %v2495_v4, %v2490_v2  ;;  %v2189_v20 = vld [vmem:[%s2934_s5] ss:$0 sm:$0xff]  ;;  %vm130_vm5 = vcmp.ge.s32.totalorder %v2512_v24, 1  ;;  %vm132_vm7 = vcmp.lt.s32.totalorder %v2512_v24, 7  ;;  %s1739_s5 = sshll.u32 %s2919_s20, 4  ;;  %s1740_s5 = int_to_ptr.hbm [resolvable:$true] %s1739_s5 }
  0x1e   :  { %236 = vmatpush.bf16.msra.mxu1 %v2113_v9  ;;  %v2190_v46 = vld [vmem:[%s2935_s1] ss:$0 sm:$0xff] }
  0x1f   :  { %277 = vmatpush.bf16.msra.mxu2 %v2109_v13 }
  0x20   :  { %169 = vmatpush.bf16.msra.mxu0 %v2106_v1  ;;  %335 = vmatpush.bf16.msra.mxu3 %v2117_v14 }
  0x22   :  { %237 = vmatpush.bf16.msra.mxu1 %v2112_v12 }
  0x23   :  { %1779 = vmatmul.msk.bf16.vlgmr.msra.gmra.mxu0 %vm158_vm0, %v137_v5  ;;  %278 = vmatpush.bf16.msra.mxu2 %v2108_v15 }
  0x24   :  { %336 = vmatpush.bf16.msra.mxu3 %v2116_v16  ;;  %460 = vmatpush.bf16.msrb.mxu0 %v2127_v21 }
  0xa0   :  { %v171_v19 = vpop.f32.mrf.mxu0 }
  0xa1   :  { %v2510_v23 = vadd.f32 %v2189_v20, %v171_v19 }
  0xa3   :  { %v176_v27 = vrot.slane %v2510_v23, 7  ;;  %v285_v28 = vrot.slane %v2510_v23, 1 }
  0xa8   :  { %v173_v25 = vpop.f32.mrf.mxu0 }
  0xa9   :  { %v2514_v26 = vadd.f32 %v2189_v20, %v173_v25  ;;  %v2131_v25 = vld [vmem:[#allocation2 + $0xb8] sm:$0xff] }
  0xaa   :  { %558 = vmatpush.bf16.msrb.mxu2 %v2131_v25 }
  0xab   :  { %v177_v29 = vrot.slane %v2514_v26, 7  ;;  %v286_v30 = vrot.slane %v2514_v26, 1  ;;  %v192_v31 = vpack.c.bf16 %v2514_v26, %v2510_v23 }
  0xad   :  { %1796 = vmatmul.msk.bf16.vlgmr.msra.gmra.mxu1 %vm226_vm1, %v192_v31  ;;  %v179_v32 = vsel %vm178_vm3, %v176_v27, %v177_v29  ;;  %v180_v33 = vsel %vm178_vm3, %v177_v29, %v176_v27  ;;  %v288_v34 = vsel %vm287_vm4, %v285_v28, %v286_v30  ;;  %v289_v35 = vsel %vm287_vm4, %v286_v30, %v285_v28  ;;  %v2126_v27 = vld [vmem:[#allocation2 + $0x90] sm:$0xff]  ;;  %v2123_v28 = vld [vmem:[#allocation2 + $0x78] sm:$0xff]  ;;  %v2125_v30 = vld [vmem:[#allocation2 + $0x88] sm:$0xff] }
  0xae   :  { %v181_v36 = vsel %vm129_vm2, %v180_v33, 0.0  ;;  %v182_v37 = vsel %vm130_vm5, %v179_v32, 0.0  ;;  %v290_v38 = vsel %vm131_vm6, %v288_v34, 0.0  ;;  %v291_v39 = vsel %vm132_vm7, %v289_v35, 0.0  ;;  %461 = vmatpush.bf16.msrb.mxu0 %v2126_v27  ;;  %501 = vmatpush.bf16.msrb.mxu1 %v2123_v28  ;;  %v2130_v29 = vld [vmem:[#allocation2 + $0xb0] sm:$0xff]  ;;  %v2129_v32 = vld [vmem:[#allocation2 + $0xa8] sm:$0xff] }
  0xaf   :  { %v183_v40 = vpack.c.bf16 %v182_v37, %v181_v36  ;;  %v292_v41 = vpack.c.bf16 %v291_v39, %v290_v38  ;;  %v2122_v31 = vld [vmem:[#allocation2 + $0x70] sm:$0xff]  ;;  %559 = vmatpush.bf16.msrb.mxu2 %v2130_v29  ;;  %v2124_v33 = vld [vmem:[#allocation2 + $0x80] sm:$0xff]  ;;  %v2121_v34 = vld [vmem:[#allocation2 + $0x68] sm:$0xff] }
  0xb0   :  { %v2128_v35 = vld [vmem:[#allocation2 + $0xa0] sm:$0xff] }
  0xb1   :  { %1813 = vmatmul.msk.bf16.vlgmr.msra.gmra.mxu2 %vm226_vm1, %v183_v40  ;;  %1830 = vmatmul.msk.bf16.vlgmr.msra.gmra.mxu3 %vm226_vm1, %v292_v41  ;;  %v2120_v36 = vld [vmem:[#allocation2 + $0x60] sm:$0xff] }
  0xb2   :  { %462 = vmatpush.bf16.msrb.mxu0 %v2125_v30  ;;  %502 = vmatpush.bf16.msrb.mxu1 %v2122_v31 }
  0xb3   :  { %560 = vmatpush.bf16.msrb.mxu2 %v2129_v32 }
  0xb6   :  { %463 = vmatpush.bf16.msrb.mxu0 %v2124_v33  ;;  %503 = vmatpush.bf16.msrb.mxu1 %v2121_v34 }
  0xb7   :  { %561 = vmatpush.bf16.msrb.mxu2 %v2128_v35 }
  0xba   :  { %504 = vmatpush.bf16.msrb.mxu1 %v2120_v36 }
 0x12a   :  { %v239_v42 = vpop.f32.mrf.mxu1 }
 0x132   :  { %v241_v50 = vpop.f32.mrf.mxu1 }
 0x134   :  { %v280_v43 = vpop.f32.mrf.mxu2  ;;  %v338_v44 = vpop.f32.mrf.mxu3 }
 0x135   :  { %v281_v45 = vadd.f32 %v280_v43, %v239_v42 }
 0x137   :  { %v343_v47 = vadd.f32 %v338_v44, %v281_v45 }
 0x139   :  { %v2550_v48 = vadd.f32 %v2190_v46, %v343_v47 }
 0x13b   :  { %v1831_v49 = vmul.f32 -1.442695, %v2550_v48 }
 0x13c   :  { %v282_v51 = vpop.f32.mrf.mxu2  ;;  %v340_v53 = vpop.f32.mrf.mxu3 }
 0x13d   :  { %2200 = vpow2.f32 %v1831_v49  ;;  %v283_v52 = vadd.f32 %v282_v51, %v241_v50 }
 0x13f   :  { %v344_v54 = vadd.f32 %v340_v53, %v283_v52 }
 0x141   :  { %v2553_v55 = vadd.f32 %v2190_v46, %v344_v54 }
 0x143   :  { %v2201_v56 = vpop.eup %2200  ;;  %v1832_v57 = vmul.f32 -1.442695, %v2553_v55 }
 0x144   :  { %v357_v58 = vadd.f32 1.0, %v2201_v56 }
 0x145   :  { %2202 = vpow2.f32 %v1832_v57 }
 0x146   :  { %2204 = vrcp.f32 %v357_v58  ;;  %v370_v0 = vand.u32 2147483648, %v357_v58  ;;  %v368_v3 = vand.u32 2147483647, %v357_v58  ;;  %vm364_vm9 = vweird.f32 %v357_v58 }
 0x148   :  { %v371_v7 = vor.u32 1.1754944e-38, %v370_v0  ;;  %vm369_vm11 = vcmp.eq.f32.partialorder %v368_v3, 8.507059e+37  ;;  %v2191_v3 = vld [vmem:[%s2935_s1 + $0x1] ss:$0 sm:$0xff] }
 0x14b   :  { %v2203_v59 = vpop.eup %2202 }
 0x14c   :  { %v2205_v60 = vpop.eup %2204  ;;  %v358_v61 = vadd.f32 1.0, %v2203_v59  ;;  %v2136_v59 = vld [vmem:[%s2907_s8] sm:$0xff] }
 0x14d   :  { %v360_v62 = vmul.f32 %v2205_v60, %v357_v58  ;;  %vm365_vm8 = vweird.f32 %v2205_v60  ;;  %v2137_v58 = vld [vmem:[%s2907_s8 + $0x8] sm:$0xff]  ;;  %s2359_s8 = smov 8  }
 0x14e   :  { %2206 = vrcp.f32 %v358_v61  ;;  %vm366_vm10 = vmor %vm364_vm9, %vm365_vm8  ;;  %v385_v12 = vand.u32 2147483648, %v358_v61  ;;  %v383_v14 = vand.u32 2147483647, %v358_v61  ;;  %vm379_vm13 = vweird.f32 %v358_v61  ;;  %733 = vmatpush.bf16.msra.mxu0 %v2137_v58 }
 0x14f   :  { %v361_v63 = vsub.f32 1.0, %v360_v62 }
 0x150   :  { %v386_v16 = vor.u32 1.1754944e-38, %v385_v12  ;;  %vm384_vm15 = vcmp.eq.f32.partialorder %v383_v14, 8.507059e+37 }
 0x151   :  { %v362_v1 = vmul.f32 %v2205_v60, %v361_v63 }
 0x152   :  { %734 = vmatpush.bf16.msra.mxu0 %v2136_v59  ;;  %v2134_v59 = vld [vmem:[%s2905_s6 + $0x10] sm:$0xff] }
 0x153   :  { %v363_v5 = vadd.f32 %v2205_v60, %v362_v1 }
 0x154   :  { %v2207_v6 = vpop.eup %2206 }
 0x155   :  { %v367_v8 = vsel %vm366_vm10, %v2205_v60, %v363_v5  ;;  %v375_v9 = vmul.f32 %v2207_v6, %v358_v61  ;;  %vm380_vm12 = vweird.f32 %v2207_v6  ;;  %v2600_v60 = vld [vmem:[%s2936_s3] sm:$0xff]  ;;  %v2605_v61 = vld [vmem:[%s2936_s3 + $0x8] sm:$0xff] }
 0x156   :  { %v372_v10 = vsel %vm369_vm11, %v371_v7, %v367_v8  ;;  %vm381_vm14 = vmor %vm379_vm13, %vm380_vm12  ;;  %v703_v62 = vpack.c.bf16 %v2605_v61, %v2600_v60  ;;  %vm743_vm13 = vcmp.lt.s32.totalorder %v2501_v18, 2 }
 0x157   :  { %391 = vrot.lane.b32.xlu0 %v372_v10, %s2353_s30  ;;  %v376_v11 = vsub.f32 1.0, %v375_v9 }
 0x159   :  { %v377_v13 = vmul.f32 %v2207_v6, %v376_v11 }
 0x15b   :  { %v378_v15 = vadd.f32 %v2207_v6, %v377_v13 }
 0x15d   :  { %v382_v19 = vsel %vm381_vm14, %v2207_v6, %v378_v15  ;;  %vm133_vm14 = vcmp.ge.s32.totalorder %v2508_v22, 2 }
 0x15e   :  { %v387_v20 = vsel %vm384_vm15, %v386_v16, %v382_v19  ;;  %vm134_vm15 = vcmp.ge.s32.totalorder %v2512_v24, 2 }
 0x15f   :  { %393 = vrot.lane.b32.xlu0 %v387_v20, %s2353_s30 }
 0x1c9   :  { %v392_v37 = vpop.permute.xlu0 %391 }
 0x1ca   :  { %v397_v38 = vmul.f32 %v392_v37, %v2550_v48 }
 0x1cc   :  { %v399_v39 = vadd.f32 %v397_v38, %v2510_v23 }
 0x1ce   :  { %v2561_v42 = vmul.f32 0.70710677, %v399_v39 }
 0x1d0   :  { %v403_v45 = vrot.slane %v2561_v42, 7  ;;  %v511_v46 = vrot.slane %v2561_v42, 1 }
 0x1d1   :  { %v394_v40 = vpop.permute.xlu0 %393 }
 0x1d2   :  { %v398_v41 = vmul.f32 %v394_v40, %v2553_v55 }
 0x1d4   :  { %v400_v43 = vadd.f32 %v398_v41, %v2514_v26 }
 0x1d6   :  { %v2564_v44 = vmul.f32 0.70710677, %v400_v43 }
 0x1d8   :  { %v404_v47 = vrot.slane %v2564_v44, 7  ;;  %v512_v49 = vrot.slane %v2564_v44, 1  ;;  %v419_v23 = vpack.c.bf16 %v2564_v44, %v2561_v42 }
 0x1da   :  { %1849 = vmatmul.msk.bf16.vlgmr.msrb.gmra.mxu0 %vm226_vm1, %v419_v23  ;;  %v405_v48 = vsel %vm178_vm3, %v403_v45, %v404_v47  ;;  %v406_v26 = vsel %vm178_vm3, %v404_v47, %v403_v45  ;;  %v513_v50 = vsel %vm287_vm4, %v511_v46, %v512_v49  ;;  %v514_v51 = vsel %vm287_vm4, %v512_v49, %v511_v46  ;;  %v2141_v49 = vld [vmem:[#allocation5 + $0x18] sm:$0xff]  ;;  %v2140_v23 = vld [vmem:[#allocation5 + $0x10] sm:$0xff] }
 0x1db   :  { %v407_v52 = vsel %vm129_vm2, %v406_v26, 0.0  ;;  %v408_v53 = vsel %vm130_vm5, %v405_v48, 0.0  ;;  %v515_v54 = vsel %vm131_vm6, %v513_v50, 0.0  ;;  %v516_v55 = vsel %vm132_vm7, %v514_v51, 0.0  ;;  %845 = vmatpush.bf16.msra.mxu2 %v2141_v49  ;;  %v2145_v48 = vld [vmem:[#allocation5 + $0x38] sm:$0xff] }
 0x1dc   :  { %v409_v56 = vpack.c.bf16 %v408_v53, %v407_v52  ;;  %v517_v57 = vpack.c.bf16 %v516_v55, %v515_v54  ;;  %804 = vmatpush.bf16.msra.mxu1 %v2145_v48  ;;  %v2192_v50 = vld [vmem:[%s2908_s9] ss:$0 sm:$0xff]  ;;  %v2135_v53 = vld [vmem:[%s2905_s6 + $0x18] sm:$0xff]  ;;  %v2139_v54 = vld [vmem:[#allocation5 + $0x8] sm:$0xff] }
 0x1dd   :  { %673 = vmatpush.bf16.msrb.mxu3 %v2135_v53 }
 0x1de   :  { %1866 = vmatmul.msk.bf16.vlgmr.msrb.gmra.mxu1 %vm226_vm1, %v409_v56  ;;  %1883 = vmatmul.msk.bf16.vlgmr.msrb.gmra.mxu2 %vm226_vm1, %v517_v57  ;;  %v2144_v57 = vld [vmem:[#allocation5 + $0x30] sm:$0xff] }
 0x1df   :  { %846 = vmatpush.bf16.msra.mxu2 %v2140_v23 }
 0x1e0   :  { %805 = vmatpush.bf16.msra.mxu1 %v2144_v57 }
 0x1e1   :  { %674 = vmatpush.bf16.msrb.mxu3 %v2134_v59  ;;  %v2194_v59 = vld [vmem:[%s2910_s11] ss:$0 sm:$0xff] }
 0x1e3   :  { %847 = vmatpush.bf16.msra.mxu2 %v2139_v54 }
 0x1ea   :  { %1912 = vmatmul.msk.bf16.vlgmr.msra.gmra.mxu0 %vm158_vm0, %v703_v62  ;;  %v2138_v62 = vld [vmem:[#allocation5] sm:$0xff] }
 0x1eb   :  { %848 = vmatpush.bf16.msra.mxu2 %v2138_v62 }
 0x257   :  { %v465_v0 = vpop.f32.mrf.mxu0 }
 0x25b   :  { %v506_v63 = vpop.f32.mrf.mxu1 }
 0x25c   :  { %v507_v1 = vadd.f32 %v506_v63, %v465_v0 }
 0x25f   :  { %v467_v10 = vpop.f32.mrf.mxu0 }
 0x261   :  { %v563_v5 = vpop.f32.mrf.mxu2 }
 0x262   :  { %v568_v6 = vadd.f32 %v563_v5, %v507_v1  ;;  %v2143_v5 = vld [vmem:[#allocation5 + $0x28] sm:$0xff] }
 0x263   :  { %v508_v8 = vpop.f32.mrf.mxu1  ;;  %806 = vmatpush.bf16.msra.mxu1 %v2143_v5 }
 0x264   :  { %v2613_v7 = vadd.f32 %v2191_v3, %v568_v6  ;;  %v509_v11 = vadd.f32 %v508_v8, %v467_v10 }
 0x266   :  { %v1885_v9 = vmul.f32 -1.442695, %v2613_v7 }
 0x267   :  { %v736_v26 = vpop.f32.mrf.mxu0 }
 0x268   :  { %2208 = vpow2.f32 %v1885_v9  ;;  %v2624_v51 = vadd.f32 %v2192_v50, %v736_v26  ;;  %v2133_v9 = vld [vmem:[%s2905_s6 + $0x8] sm:$0xff] }
 0x269   :  { %v565_v12 = vpop.f32.mrf.mxu2  ;;  %675 = vmatpush.bf16.msrb.mxu3 %v2133_v9 }
 0x26a   :  { %v569_v13 = vadd.f32 %v565_v12, %v509_v11  ;;  %v741_v55 = vrot.slane %v2624_v51, 6  ;;  %v757_v63 = vrot.slane %v2624_v51, 7 }
 0x26c   :  { %v2616_v14 = vadd.f32 %v2191_v3, %v569_v13  ;;  %v2142_v13 = vld [vmem:[#allocation5 + $0x20] sm:$0xff] }
 0x26d   :  { %807 = vmatpush.bf16.msra.mxu1 %v2142_v13 }
 0x26e   :  { %v2209_v15 = vpop.eup %2208  ;;  %v1886_v16 = vmul.f32 -1.442695, %v2616_v14 }
 0x26f   :  { %v583_v19 = vadd.f32 1.0, %v2209_v15  ;;  %v738_v52 = vpop.f32.mrf.mxu0  ;;  %v2132_v15 = vld [vmem:[%s2905_s6] sm:$0xff] }
 0x270   :  { %2210 = vpow2.f32 %v1886_v16  ;;  %v2630_v56 = vadd.f32 %v2192_v50, %v738_v52  ;;  %676 = vmatpush.bf16.msrb.mxu3 %v2132_v15 }
 0x271   :  { %2212 = vrcp.f32 %v583_v19  ;;  %v596_v29 = vand.u32 2147483648, %v583_v19  ;;  %v594_v31 = vand.u32 2147483647, %v583_v19  ;;  %vm590_vm6 = vweird.f32 %v583_v19 }
 0x272   :  { %v742_v58 = vrot.slane %v2630_v56, 6  ;;  %v758_v3 = vrot.slane %v2630_v56, 7 }
 0x273   :  { %v597_v34 = vor.u32 1.1754944e-38, %v596_v29  ;;  %vm595_vm8 = vcmp.eq.f32.partialorder %v594_v31, 8.507059e+37  ;;  %v2152_v31 = vld [vmem:[%s2911_s12 + $0x10] sm:$0xff] }
 0x274   :  { %v744_v0 = vsel %vm743_vm13, %v741_v55, %v742_v58  ;;  %v745_v1 = vsel %vm743_vm13, %v742_v58, %v741_v55  ;;  %v759_v11 = vsel %vm178_vm3, %v757_v63, %v758_v3  ;;  %v760_v12 = vsel %vm178_vm3, %v758_v3, %v757_v63 }
 0x275   :  { %v746_v6 = vsel %vm133_vm14, %v745_v1, 0.0  ;;  %v747_v8 = vsel %vm134_vm15, %v744_v0, 0.0  ;;  %v761_v16 = vsel %vm129_vm2, %v760_v12, 0.0 }
 0x276   :  { %v2211_v20 = vpop.eup %2210  ;;  %v748_v10 = vpack.c.bf16 %v747_v8, %v746_v6 }
 0x277   :  { %v2213_v21 = vpop.eup %2212  ;;  %v584_v25 = vadd.f32 1.0, %v2211_v20 }
 0x278   :  { %v586_v27 = vmul.f32 %v2213_v21, %v583_v19  ;;  %vm591_vm4 = vweird.f32 %v2213_v21  ;;  %1946 = vmatmul.msk.bf16.vlgmr.msra.gmra.mxu2 %vm226_vm1, %v748_v10  ;;  %v762_v19 = vsel %vm130_vm5, %v759_v11, 0.0 }
 0x279   :  { %2214 = vrcp.f32 %v584_v25  ;;  %vm592_vm7 = vmor %vm590_vm6, %vm591_vm4  ;;  %v611_v39 = vand.u32 2147483648, %v584_v25  ;;  %v609_v41 = vand.u32 2147483647, %v584_v25  ;;  %vm605_vm10 = vweird.f32 %v584_v25 }
 0x27a   :  { %v587_v28 = vsub.f32 1.0, %v586_v27  ;;  %v763_v20 = vpack.c.bf16 %v762_v19, %v761_v16  ;;  %v2147_v27 = vld [vmem:[#allocation5 + $0x48] sm:$0xff] }
 0x27b   :  { %v612_v45 = vor.u32 1.1754944e-38, %v611_v39  ;;  %vm610_vm12 = vcmp.eq.f32.partialorder %v609_v41, 8.507059e+37 }
 0x27c   :  { %v588_v30 = vmul.f32 %v2213_v21, %v587_v28  ;;  %1929 = vmatmul.msk.bf16.vlgmr.msra.gmra.mxu1 %vm226_vm1, %v763_v20  ;;  %v2146_v28 = vld [vmem:[#allocation5 + $0x40] sm:$0xff] }
 0x27e   :  { %v589_v32 = vadd.f32 %v2213_v21, %v588_v30  ;;  %v2153_v30 = vld [vmem:[%s2911_s12 + $0x18] sm:$0xff] }
 0x27f   :  { %v2215_v33 = vpop.eup %2214  ;;  %1002 = vmatpush.bf16.msrb.mxu0 %v2153_v30 }
 0x280   :  { %v593_v35 = vsel %vm592_vm7, %v2213_v21, %v589_v32  ;;  %v601_v36 = vmul.f32 %v2215_v33, %v584_v25  ;;  %vm606_vm9 = vweird.f32 %v2215_v33  ;;  %v2149_v21 = vld [vmem:[#allocation5 + $0x58] sm:$0xff]  ;;  %v2148_v25 = vld [vmem:[#allocation5 + $0x50] sm:$0xff] }
 0x281   :  { %v598_v37 = vsel %vm595_vm8, %v597_v34, %v593_v35  ;;  %vm607_vm11 = vmor %vm605_vm10, %vm606_vm9  ;;  %896 = vmatpush.bf16.msra.mxu3 %v2149_v21 }
 0x282   :  { %617 = vrot.lane.b32.xlu1 %v598_v37, %s2353_s30  ;;  %v602_v38 = vsub.f32 1.0, %v601_v36  ;;  %v2356_v37 = vmov 0.0|0.0  }
 0x283   :  { %1003 = vmatpush.bf16.msrb.mxu0 %v2152_v31 }
 0x284   :  { %v603_v40 = vmul.f32 %v2215_v33, %v602_v38  ;;  %v1122_v38 = vunpack.c.l.b16 %v2356_v37 }
 0x285   :  { %897 = vmatpush.bf16.msra.mxu3 %v2148_v25 }
 0x286   :  { %v604_v43 = vadd.f32 %v2215_v33, %v603_v40 }
 0x288   :  { %v608_v46 = vsel %vm607_vm11, %v2215_v33, %v604_v43  ;;  %v2151_v33 = vld [vmem:[%s2911_s12 + $0x8] sm:$0xff]  ;;  %v2678_v43 = vpack.c.b16 %v1122_v38, %v1122_v38 }
 0x289   :  { %v613_v47 = vsel %vm610_vm12, %v612_v45, %v608_v46  ;;  %898 = vmatpush.bf16.msra.mxu3 %v2147_v27  ;;  %1004 = vmatpush.bf16.msrb.mxu0 %v2151_v33 }
 0x28a   :  { %619 = vrot.lane.b32.xlu1 %v613_v47, %s2353_s30 }
 0x28d   :  { %899 = vmatpush.bf16.msra.mxu3 %v2146_v28 }
 0x2f4   :  { %v618_v29 = vpop.permute.xlu1 %617 }
 0x2f5   :  { %v623_v32 = vmul.f32 %v618_v29, %v2613_v7 }
 0x2f7   :  { %v625_v35 = vadd.f32 %v623_v32, %v2561_v42  ;;  %v855_v42 = vpack.c.bf16 %v2630_v56, %v2624_v51 }
 0x2f9   :  { %v627_v40 = vmul.f32 0.70710677, %v625_v35  ;;  %v809_v52 = vpop.f32.mrf.mxu1 }
 0x2fb   :  { %v850_v53 = vpop.f32.mrf.mxu2 }
 0x2fc   :  { %v620_v34 = vpop.permute.xlu1 %619  ;;  %v851_v57 = vadd.f32 %v850_v53, %v809_v52 }
 0x2fd   :  { %v624_v36 = vmul.f32 %v620_v34, %v2616_v14  ;;  %v2193_v14 = vld [vmem:[%s2906_s7] ss:$0 sm:$0xff] }
 0x2ff   :  { %v626_v39 = vadd.f32 %v624_v36, %v2564_v44  ;;  %v2150_v44 = vld [vmem:[%s2911_s12] sm:$0xff] }
 0x300   :  { %1005 = vmatpush.bf16.msrb.mxu0 %v2150_v44 }
 0x301   :  { %v628_v41 = vmul.f32 0.70710677, %v626_v39 }
 0x303   :  { %v629_v7 = vpack.c.bf16 %v628_v41, %v627_v40  ;;  %v852_v5 = vpop.f32.mrf.mxu2 }
 0x304   :  { %1144 = vmatpush.bf16.msra.mxu0 %v2678_v43 }
 0x305   :  { %1903 = vmatmul.msk.bf16.vlgmr.msrb.gmra.mxu3 %vm226_vm1, %v629_v7 }
 0x306   :  { %1127 = vmatpush.bf16.msrb.mxu3 %v2678_v43 }
 0x308   :  { %1145 = vmatpush.bf16.msra.mxu0 %v2678_v43 }
 0x30a   :  { %1128 = vmatpush.bf16.msrb.mxu3 %v2678_v43 }
 0x30c   :  { %1146 = vmatpush.bf16.msra.mxu0 %v2678_v43 }
 0x30e   :  { %1129 = vmatpush.bf16.msrb.mxu3 %v2678_v43 }
 0x310   :  { %1147 = vmatpush.bf16.msra.mxu0 %v2678_v43 }
 0x312   :  { %1130 = vmatpush.bf16.msrb.mxu3 %v2678_v43 }
 0x314   :  { %1148 = vmatpush.bf16.msra.mxu0 %v2678_v43 }
 0x315   :  { %1963 = vmatmul.msk.bf16.vlgmr.msra.gmra.mxu3 %vm226_vm1, %v855_v42 }
 0x316   :  { %1131 = vmatpush.bf16.msrb.mxu3 %v2678_v43 }
 0x318   :  { %1149 = vmatpush.bf16.msra.mxu0 %v2678_v43 }
 0x31a   :  { %1132 = vmatpush.bf16.msrb.mxu3 %v2678_v43 }
 0x31c   :  { %1150 = vmatpush.bf16.msra.mxu0 %v2678_v43 }
 0x31e   :  { %1133 = vmatpush.bf16.msrb.mxu3 %v2678_v43 }
 0x388   :  { %v678_v45 = vpop.f32.mrf.mxu3 }
 0x389   :  { %v2704_v46 = vadd.f32 %v2193_v14, %v678_v45 }
 0x38b   :  { %v683_v47 = vadd.f32 %v2704_v46, %v2490_v2  ;;  %1983 = vmatpush.xpose.msk.msrb.mxu1 %vm158_vm0, %v2704_v46 }
 0x38d   :  { %v685_v49 = vmul.f32 0.70710677, %v683_v47 }
 0x38f   :  { %v690_v23 = vpack.c.bf16 %v685_v49, %v685_v49 }
 0x390   :  { %v680_v48 = vpop.f32.mrf.mxu3 }
 0x391   :  { %v2710_v26 = vadd.f32 %v2193_v14, %v680_v48  ;;  %v1121_v50 = vunpack.c.l.b16 %v690_v23  ;;  %v2739_v23 = vld [vmem:[%s2912_s13] ss:$0 sm:$0xff] }
 0x393   :  { %v684_v54 = vadd.f32 %v2710_v26, %v2495_v4  ;;  %1985 = vmatpush.xpose.msk.msrb.mxu2 %vm158_vm0, %v2710_v26  ;;  %v2716_v55 = vpack.c.b16 %v1122_v38, %v1121_v50  ;;  %v811_v4 = vpop.f32.mrf.mxu1 }
 0x394   :  { %v853_v8 = vadd.f32 %v852_v5, %v811_v4 }
 0x395   :  { %v686_v2 = vmul.f32 0.70710677, %v684_v54  ;;  %1134 = vmatpush.bf16.msrb.mxu3 %v2716_v55 }
 0x397   :  { %v692_v58 = vpack.c.bf16 %v686_v2, %v686_v2 }
 0x398   :  { %v901_v62 = vpop.f32.mrf.mxu3 }
 0x399   :  { %v906_v63 = vadd.f32 %v901_v62, %v851_v57  ;;  %v1141_v0 = vunpack.c.l.b16 %v692_v58 }
 0x39b   :  { %v912_v1 = vadd.f32 %v2194_v59, %v906_v63  ;;  %v2722_v3 = vpack.c.b16 %v1122_v38, %v1141_v0 }
 0x39d   :  { %v1964_v6 = vmul.f32 -1.442695, %v912_v1  ;;  %1151 = vmatpush.bf16.msra.mxu0 %v2722_v3 }
 0x39f   :  { %2216 = vpow2.f32 %v1964_v6 }
 0x3a0   :  { %v903_v9 = vpop.f32.mrf.mxu3 }
 0x3a1   :  { %v907_v10 = vadd.f32 %v903_v9, %v853_v8 }
 0x3a3   :  { %v913_v11 = vadd.f32 %v2194_v59, %v907_v10 }
 0x3a5   :  { %v2217_v12 = vpop.eup %2216  ;;  %v1965_v13 = vmul.f32 -1.442695, %v913_v11 }
 0x3a6   :  { %v920_v15 = vadd.f32 1.0, %v2217_v12  ;;  %v2170_v12 = vld [vmem:[%s2911_s12 + $0x10] sm:$0xff] }
 0x3a7   :  { %2218 = vpow2.f32 %v1965_v13  ;;  %v2169_v13 = vld [vmem:[%s2911_s12 + $0x8] sm:$0xff] }
 0x3a8   :  { %2220 = vrcp.f32 %v920_v15  ;;  %v933_v27 = vand.u32 2147483648, %v920_v15  ;;  %v931_v29 = vand.u32 2147483647, %v920_v15  ;;  %vm927_vm6 = vweird.f32 %v920_v15 }
 0x3aa   :  { %v934_v32 = vor.u32 1.1754944e-38, %v933_v27  ;;  %vm932_vm8 = vcmp.eq.f32.partialorder %v931_v29, 8.507059e+37 }
 0x3ad   :  { %v2219_v16 = vpop.eup %2218 }
 0x3ae   :  { %v2221_v19 = vpop.eup %2220  ;;  %v921_v20 = vadd.f32 1.0, %v2219_v16 }
 0x3af   :  { %v923_v21 = vmul.f32 %v2221_v19, %v920_v15  ;;  %vm928_vm4 = vweird.f32 %v2221_v19  ;;  %v2168_v15 = vld [vmem:[%s2911_s12] sm:$0xff] }
 0x3b0   :  { %2222 = vrcp.f32 %v921_v20  ;;  %vm929_vm7 = vmor %vm927_vm6, %vm928_vm4  ;;  %v948_v37 = vand.u32 2147483648, %v921_v20  ;;  %v946_v39 = vand.u32 2147483647, %v921_v20  ;;  %vm942_vm10 = vweird.f32 %v921_v20 }
 0x3b1   :  { %v924_v25 = vsub.f32 1.0, %v923_v21 }
 0x3b2   :  { %v949_v41 = vor.u32 1.1754944e-38, %v948_v37  ;;  %vm947_vm12 = vcmp.eq.f32.partialorder %v946_v39, 8.507059e+37 }
 0x3b3   :  { %v925_v28 = vmul.f32 %v2221_v19, %v924_v25 }
 0x3b5   :  { %v926_v30 = vadd.f32 %v2221_v19, %v925_v28 }
 0x3b6   :  { %v2223_v31 = vpop.eup %2222 }
 0x3b7   :  { %v930_v33 = vsel %vm929_vm7, %v2221_v19, %v926_v30  ;;  %v938_v34 = vmul.f32 %v2223_v31, %v921_v20  ;;  %vm943_vm9 = vweird.f32 %v2223_v31 }
 0x3b8   :  { %v935_v35 = vsel %vm932_vm8, %v934_v32, %v930_v33  ;;  %vm944_vm11 = vmor %vm942_vm10, %vm943_vm9 }
 0x3b9   :  { %954 = vrot.lane.b32.xlu2 %v935_v35, %s2353_s30  ;;  %v939_v36 = vsub.f32 1.0, %v938_v34  ;;  %v2155_v35 = vld [vmem:[%s2913_s14 + $0x8] sm:$0xff] }
 0x3ba   :  { %1183 = vmatpush.bf16.msra.mxu1 %v2155_v35 }
 0x3bb   :  { %v940_v38 = vmul.f32 %v2223_v31, %v939_v36 }
 0x3bd   :  { %v941_v40 = vadd.f32 %v2223_v31, %v940_v38  ;;  %v2154_v38 = vld [vmem:[%s2913_s14] sm:$0xff] }
 0x3be   :  { %1184 = vmatpush.bf16.msra.mxu1 %v2154_v38 }
 0x3bf   :  { %v945_v7 = vsel %vm944_vm11, %v2223_v31, %v941_v40  ;;  %v2159_v40 = vld [vmem:[#allocation5 + $0x78] sm:$0xff] }
 0x3c0   :  { %v950_v42 = vsel %vm947_vm12, %v949_v41, %v945_v7 }
 0x3c1   :  { %956 = vrot.lane.b32.xlu2 %v950_v42, %s2353_s30 }
 0x413   :  { %v955_v44 = vpop.permute.xlu2 %954 }
 0x414   :  { %v2727_v45 = vmul.f32 %v955_v44, %v912_v1 }
 0x41b   :  { %v957_v14 = vpop.permute.xlu2 %956 }
 0x41c   :  { %v2729_v47 = vmul.f32 %v957_v14, %v913_v11  ;;  %v2171_v11 = vld [vmem:[%s2911_s12 + $0x18] sm:$0xff]  ;;  %s2357_s12 = smov [#allocation8]  }
 0x41d   :  { %1461 = vmatpush.bf16.msra.mxu3 %v2171_v11  ;;  %s1750_s27 = sshll.u32 %s2357_s12, 4  ;;  %s1751_s27 = int_to_ptr.vmem [resolvable:$true] %s1750_s27 }
 0x41e   :  { %v962_v49 = vpack.c.bf16 %v2729_v47, %v2727_v45 }
 0x420   :  { %1982 = vmatmul.msk.bf16.vlgmr.msrb.gmra.mxu0 %vm226_vm1, %v962_v49 }
 0x421   :  { %2067 = vmatpush.xpose.msk.msrb.mxu0 %vm158_vm0, %v2704_v46  ;;  %v2748_v46 = vand.u32 127, %v102_v17  ;;  %1462 = vmatpush.bf16.msra.mxu3 %v2170_v12 }
 0x423   :  { %vm689_vm4 = vcmp.lt.s32.totalorder %v2748_v46, 8 }
 0x425   :  { %1463 = vmatpush.bf16.msra.mxu3 %v2169_v13 }
 0x429   :  { %1464 = vmatpush.bf16.msra.mxu3 %v2168_v15 }
 0x49d   :  { %v1007_v48 = vpop.f32.mrf.mxu0 }
 0x49e   :  { %v1008_v50 = vadd.f32 %v2739_v23, %v1007_v48 }
 0x4a0   :  { %v1012_v52 = vadd.f32 %v1008_v50, %v2600_v60 }
 0x4a2   :  { %v1014_v53 = vmul.f32 0.70710677, %v1012_v52 }
 0x4a4   :  { %1984 = vmatmul.msk.f32.vlgmr.msrb.gmra.mxu1 %vm158_vm0, %v1014_v53 }
 0x4a5   :  { %v1009_v54 = vpop.f32.mrf.mxu0  ;;  %1303 = vmatpush.bf16.msrb.mxu1 %v2159_v40 }
 0x4a6   :  { %v1010_v2 = vadd.f32 %v2739_v23, %v1009_v54  ;;  %v2158_v54 = vld [vmem:[#allocation5 + $0x70] sm:$0xff] }
 0x4a8   :  { %v1013_v57 = vadd.f32 %v1010_v2, %v2605_v61  ;;  %v2157_v2 = vld [vmem:[#allocation5 + $0x68] sm:$0xff] }
 0x4a9   :  { %1304 = vmatpush.bf16.msrb.mxu1 %v2158_v54 }
 0x4aa   :  { %v1015_v58 = vmul.f32 0.70710677, %v1013_v57  ;;  %v2156_v57 = vld [vmem:[#allocation5 + $0x60] sm:$0xff] }
 0x4ac   :  { %1986 = vmatmul.msk.f32.vlgmr.msrb.gmra.mxu2 %vm158_vm0, %v1015_v58  ;;  %v2163_v58 = vld [vmem:[#allocation5 + $0x98] sm:$0xff] }
 0x4ad   :  { %1305 = vmatpush.bf16.msrb.mxu1 %v2157_v2  ;;  %1262 = vmatpush.bf16.msra.mxu2 %v2163_v58 }
 0x4b1   :  { %1306 = vmatpush.bf16.msrb.mxu1 %v2156_v57 }
 0x521   :  { %v1042_v59 = vpop.f32.mrf.mxu1 }
 0x522   :  { %v1071_v62 = vsel %vm689_vm4, %v1042_v59, -1e+30 }
 0x523   :  { %1073 = vmax.xlane.f32.xlu0 %v1071_v62 }
 0x52f   :  { %v1068_v63 = vpop.f32.mrf.mxu2 }
 0x530   :  { %v1072_v0 = vsel %vm689_vm4, %v1068_v63, -1e+30 }
 0x531   :  { %1075 = vmax.xlane.f32.xlu1 %v1072_v0 }
 0x596   :  { %v1074_v1 = vpop.xlane.xlu0 %1073 }
 0x597   :  { %v1077_v4 = vsub.f32 %v1071_v62, %v1074_v1 }
 0x599   :  { %v1079_v5 = vmul.f32 1.442695, %v1077_v4  ;;  %v2162_v4 = vld [vmem:[#allocation5 + $0x90] sm:$0xff] }
 0x59a   :  { %1263 = vmatpush.bf16.msra.mxu2 %v2162_v4 }
 0x59b   :  { %2224 = vpow2.f32 %v1079_v5  ;;  %v2160_v5 = vld [vmem:[#allocation5 + $0x80] sm:$0xff] }
 0x5a1   :  { %v2225_v6 = vpop.eup %2224 }
 0x5a2   :  { %1083 = vadd.xlane.f32.xlu2 %v2225_v6 }
 0x5a4   :  { %v1076_v17 = vpop.xlane.xlu1 %1075 }
 0x5a5   :  { %v1078_v8 = vsub.f32 %v1072_v0, %v1076_v17  ;;  %v2166_v17 = vld [vmem:[#allocation5 + $0xb0] sm:$0xff] }
 0x5a7   :  { %v1081_v9 = vmul.f32 1.442695, %v1078_v8  ;;  %v2165_v8 = vld [vmem:[#allocation5 + $0xa8] sm:$0xff] }
 0x5a9   :  { %2226 = vpow2.f32 %v1081_v9  ;;  %v2164_v9 = vld [vmem:[#allocation5 + $0xa0] sm:$0xff] }
 0x5af   :  { %v2227_v10 = vpop.eup %2226 }
 0x5b0   :  { %1085 = vadd.xlane.f32.xlu2 %v2227_v10 }
 0x615   :  { %v1084_v16 = vpop.xlane.xlu2 %1083 }
 0x616   :  { %2228 = vrcp.f32 %v1084_v16  ;;  %v1098_v25 = vand.u32 2147483648, %v1084_v16  ;;  %v1096_v28 = vand.u32 2147483647, %v1084_v16  ;;  %vm1092_vm7 = vweird.f32 %v1084_v16 }
 0x618   :  { %v1099_v31 = vor.u32 1.1754944e-38, %v1098_v25  ;;  %vm1097_vm9 = vcmp.eq.f32.partialorder %v1096_v28, 8.507059e+37 }
 0x61c   :  { %v2229_v19 = vpop.eup %2228 }
 0x61d   :  { %v1088_v20 = vmul.f32 %v2229_v19, %v1084_v16  ;;  %vm1093_vm6 = vweird.f32 %v2229_v19 }
 0x61e   :  { %vm1094_vm8 = vmor %vm1092_vm7, %vm1093_vm6 }
 0x61f   :  { %v1089_v21 = vsub.f32 1.0, %v1088_v20 }
 0x621   :  { %v1090_v27 = vmul.f32 %v2229_v19, %v1089_v21 }
 0x623   :  { %v1091_v29 = vadd.f32 %v2229_v19, %v1090_v27  ;;  %v1086_v30 = vpop.xlane.xlu2 %1085 }
 0x624   :  { %2230 = vrcp.f32 %v1086_v30  ;;  %v1112_v7 = vand.u32 2147483648, %v1086_v30  ;;  %v1110_v44 = vand.u32 2147483647, %v1086_v30  ;;  %vm1106_vm11 = vweird.f32 %v1086_v30 }
 0x625   :  { %v1095_v32 = vsel %vm1094_vm8, %v2229_v19, %v1091_v29 }
 0x626   :  { %v1100_v33 = vsel %vm1097_vm9, %v1099_v31, %v1095_v32  ;;  %v1113_v49 = vor.u32 1.1754944e-38, %v1112_v7  ;;  %vm1111_vm6 = vcmp.eq.f32.partialorder %v1110_v44, 8.507059e+37 }
 0x627   :  { %v1115_v34 = vmul.f32 %v2225_v6, %v1100_v33  ;;  %v2167_v6 = vld [vmem:[#allocation5 + $0xb8] sm:$0xff] }
 0x629   :  { %v1117_v36 = vpack.c.bf16 %v1115_v34, %v1115_v34 }
 0x62a   :  { %v2231_v37 = vpop.eup %2230 }
 0x62b   :  { %v1102_v39 = vmul.f32 %v2231_v37, %v1086_v30  ;;  %1135 = vmatmul.bf16.vlgmr.msrb.gmra.mxu3 %v1117_v36  ;;  %vm1107_vm10 = vweird.f32 %v2231_v37 }
 0x62c   :  { %1582 = vmatpush.bf16.msrb.mxu3 %v2678_v43  ;;  %vm1108_vm12 = vmor %vm1106_vm11, %vm1107_vm10 }
 0x62d   :  { %v1103_v41 = vsub.f32 1.0, %v1102_v39 }
 0x62f   :  { %v1104_v42 = vmul.f32 %v2231_v37, %v1103_v41  ;;  %v2197_v41 = vld [vmem:[%s2910_s11 + $0x1] ss:$0 sm:$0xff] }
 0x630   :  { %1583 = vmatpush.bf16.msrb.mxu3 %v2678_v43 }
 0x631   :  { %v1105_v14 = vadd.f32 %v2231_v37, %v1104_v42 }
 0x633   :  { %v1109_v48 = vsel %vm1108_vm12, %v2231_v37, %v1105_v14 }
 0x634   :  { %1584 = vmatpush.bf16.msrb.mxu3 %v2678_v43  ;;  %v1114_v50 = vsel %vm1111_vm6, %v1113_v49, %v1109_v48 }
 0x635   :  { %v1116_v52 = vmul.f32 %v2227_v10, %v1114_v50  ;;  %v2787_v10 = vld [vmem:[%s2914_s15] ss:$0 sm:$0xff] }
 0x637   :  { %v1118_v53 = vpack.c.bf16 %v1116_v52, %v1116_v52 }
 0x638   :  { %1585 = vmatpush.bf16.msrb.mxu3 %v2678_v43 }
 0x639   :  { %1152 = vmatmul.bf16.vlgmr.msra.gmra.mxu0 %v1118_v53 }
 0x63c   :  { %1586 = vmatpush.bf16.msrb.mxu3 %v2678_v43 }
 0x640   :  { %1587 = vmatpush.bf16.msrb.mxu3 %v2678_v43 }
 0x644   :  { %1588 = vmatpush.bf16.msrb.mxu3 %v2678_v43 }
 0x648   :  { %1589 = vmatpush.bf16.msrb.mxu3 %v2722_v3  ;;  %v2161_v3 = vld [vmem:[#allocation5 + $0x88] sm:$0xff] }
 0x649   :  { %1264 = vmatpush.bf16.msra.mxu2 %v2161_v3 }
 0x64d   :  { %1265 = vmatpush.bf16.msra.mxu2 %v2160_v5 }
 0x651   :  { %1354 = vmatpush.bf16.msrb.mxu2 %v2167_v6 }
 0x655   :  { %1355 = vmatpush.bf16.msrb.mxu2 %v2166_v17 }
 0x659   :  { %1356 = vmatpush.bf16.msrb.mxu2 %v2165_v8 }
 0x65d   :  { %1357 = vmatpush.bf16.msrb.mxu2 %v2164_v9 }
 0x6ae   :  { %v1136_v59 = vpop.f32.mrf.mxu3 }
 0x6b6   :  { %v1138_v62 = vpop.f32.mrf.mxu3  ;;  %v1153_v63 = vpop.f32.mrf.mxu0 }
 0x6b7   :  { %v1157_v0 = vpack.c.bf16 %v1153_v63, %v1136_v59 }
 0x6b9   :  { %1995 = vmatmul.msk.bf16.vlgmr.msra.gmra.mxu1 %vm158_vm0, %v1157_v0 }
 0x6ba   :  { %2069 = vmatpush.xpose.msk.msra.mxu1 %vm158_vm0, %v2710_v26 }
 0x6be   :  { %v1155_v1 = vpop.f32.mrf.mxu0 }
 0x736   :  { %v1186_v26 = vpop.f32.mrf.mxu1 }
 0x737   :  { %v1187_v11 = vadd.f32 %v2787_v10, %v1186_v26 }
 0x739   :  { %v1191_v12 = vadd.f32 %v1187_v11, %v2727_v45 }
 0x73b   :  { %v1193_v13 = vmul.f32 0.70710677, %v1191_v12 }
 0x73d   :  { %v1195_v19 = vadd.f32 %v1193_v13, %v2624_v51 }
 0x73e   :  { %v1188_v15 = vpop.f32.mrf.mxu1 }
 0x73f   :  { %v1189_v16 = vadd.f32 %v2787_v10, %v1188_v15  ;;  %v2794_v25 = vmul.f32 0.70710677, %v1195_v19 }
 0x741   :  { %v1192_v20 = vadd.f32 %v1189_v16, %v2729_v47  ;;  %v1199_v29 = vrot.slane %v2794_v25, 6  ;;  %v1215_v30 = vrot.slane %v2794_v25, 7 }
 0x743   :  { %v1194_v21 = vmul.f32 0.70710677, %v1192_v20 }
 0x745   :  { %v1196_v27 = vadd.f32 %v1194_v21, %v2630_v56 }
 0x747   :  { %v2797_v28 = vmul.f32 0.70710677, %v1196_v27 }
 0x749   :  { %v1200_v45 = vrot.slane %v2797_v28, 6  ;;  %v1216_v31 = vrot.slane %v2797_v28, 7  ;;  %v1313_v18 = vpack.c.bf16 %v2797_v28, %v2794_v25 }
 0x74b   :  { %v1217_v51 = vsel %vm178_vm3, %v1215_v30, %v1216_v31  ;;  %v1218_v47 = vsel %vm178_vm3, %v1216_v31, %v1215_v30  ;;  %v1201_v32 = vsel %vm743_vm13, %v1199_v29, %v1200_v45  ;;  %v1202_v56 = vsel %vm743_vm13, %v1200_v45, %v1199_v29 }
 0x74c   :  { %v1219_v33 = vsel %vm129_vm2, %v1218_v47, 0.0  ;;  %v1220_v34 = vsel %vm130_vm5, %v1217_v51, 0.0  ;;  %v1203_v35 = vsel %vm133_vm14, %v1202_v56, 0.0  ;;  %v1204_v36 = vsel %vm134_vm15, %v1201_v32, 0.0 }
 0x74d   :  { %v1221_v37 = vpack.c.bf16 %v1220_v34, %v1219_v33  ;;  %v1205_v38 = vpack.c.bf16 %v1204_v36, %v1203_v35 }
 0x74f   :  { %2012 = vmatmul.msk.bf16.vlgmr.msra.gmra.mxu2 %vm226_vm1, %v1221_v37  ;;  %2029 = vmatmul.msk.bf16.vlgmr.msrb.gmra.mxu1 %vm226_vm1, %v1205_v38 }
 0x750   :  { %1569 = vmatpush.bf16.msra.mxu2 %v2678_v43 }
 0x754   :  { %1570 = vmatpush.bf16.msra.mxu2 %v2678_v43 }
 0x758   :  { %1571 = vmatpush.bf16.msra.mxu2 %v2678_v43 }
 0x75c   :  { %1572 = vmatpush.bf16.msra.mxu2 %v2678_v43 }
 0x75f   :  { %2046 = vmatmul.msk.bf16.vlgmr.msrb.gmra.mxu2 %vm226_vm1, %v1313_v18 }
 0x760   :  { %1573 = vmatpush.bf16.msra.mxu2 %v2678_v43 }
 0x764   :  { %1574 = vmatpush.bf16.msra.mxu2 %v2678_v43 }
 0x768   :  { %1575 = vmatpush.bf16.msra.mxu2 %v2678_v43 }
 0x76c   :  { %1576 = vmatpush.bf16.msra.mxu2 %v2716_v55 }
 0x7cc   :  { %v1308_v39 = vpop.f32.mrf.mxu1 }
 0x7d2   :  { %v1267_v22 = vpop.f32.mrf.mxu2 }
 0x7d3   :  { %v1309_v40 = vadd.f32 %v1308_v39, %v1267_v22 }
 0x7d4   :  { %v1310_v49 = vpop.f32.mrf.mxu1 }
 0x7da   :  { %v1269_v24 = vpop.f32.mrf.mxu2 }
 0x7db   :  { %v1311_v48 = vadd.f32 %v1310_v49, %v1269_v24 }
 0x7e2   :  { %v1359_v7 = vpop.f32.mrf.mxu2 }
 0x7e3   :  { %v1364_v42 = vadd.f32 %v1359_v7, %v1309_v40 }
 0x7e5   :  { %v1371_v44 = vadd.f32 %v2197_v41, %v1364_v42 }
 0x7e7   :  { %v2048_v14 = vmul.f32 -1.442695, %v1371_v44 }
 0x7e9   :  { %2232 = vpow2.f32 %v2048_v14 }
 0x7ea   :  { %v1361_v50 = vpop.f32.mrf.mxu2 }
 0x7eb   :  { %v1365_v52 = vadd.f32 %v1361_v50, %v1311_v48 }
 0x7ed   :  { %v1372_v43 = vadd.f32 %v2197_v41, %v1365_v52 }
 0x7ef   :  { %v2233_v53 = vpop.eup %2232  ;;  %v2049_v55 = vmul.f32 -1.442695, %v1372_v43 }
 0x7f0   :  { %v1379_v54 = vadd.f32 1.0, %v2233_v53 }
 0x7f1   :  { %2234 = vpow2.f32 %v2049_v55 }
 0x7f2   :  { %2236 = vrcp.f32 %v1379_v54  ;;  %v1392_v63 = vand.u32 2147483648, %v1379_v54  ;;  %v1390_v1 = vand.u32 2147483647, %v1379_v54  ;;  %vm1386_vm3 = vweird.f32 %v1379_v54 }
 0x7f4   :  { %v1393_v5 = vor.u32 1.1754944e-38, %v1392_v63  ;;  %vm1391_vm13 = vcmp.eq.f32.partialorder %v1390_v1, 8.507059e+37 }
 0x7f7   :  { %v2235_v2 = vpop.eup %2234 }
 0x7f8   :  { %v2237_v57 = vpop.eup %2236  ;;  %v1380_v58 = vadd.f32 1.0, %v2235_v2 }
 0x7f9   :  { %v1382_v59 = vmul.f32 %v2237_v57, %v1379_v54  ;;  %vm1387_vm2 = vweird.f32 %v2237_v57 }
 0x7fa   :  { %2238 = vrcp.f32 %v1380_v58  ;;  %vm1388_vm5 = vmor %vm1386_vm3, %vm1387_vm2  ;;  %v1407_v26 = vand.u32 2147483648, %v1380_v58  ;;  %v1405_v12 = vand.u32 2147483647, %v1380_v58  ;;  %vm1401_vm15 = vweird.f32 %v1380_v58 }
 0x7fb   :  { %v1383_v62 = vsub.f32 1.0, %v1382_v59 }
 0x7fc   :  { %v1408_v15 = vor.u32 1.1754944e-38, %v1407_v26  ;;  %vm1406_vm8 = vcmp.eq.f32.partialorder %v1405_v12, 8.507059e+37 }
 0x7fd   :  { %v1384_v0 = vmul.f32 %v2237_v57, %v1383_v62 }
 0x7ff   :  { %v1385_v4 = vadd.f32 %v2237_v57, %v1384_v0 }
 0x800   :  { %v2239_v3 = vpop.eup %2238 }
 0x801   :  { %v1389_v6 = vsel %vm1388_vm5, %v2237_v57, %v1385_v4  ;;  %v1397_v17 = vmul.f32 %v2239_v3, %v1380_v58  ;;  %vm1402_vm14 = vweird.f32 %v2239_v3 }
 0x802   :  { %v1394_v8 = vsel %vm1391_vm13, %v1393_v5, %v1389_v6  ;;  %vm1403_vm7 = vmor %vm1401_vm15, %vm1402_vm14 }
 0x803   :  { %1413 = vrot.lane.b32.xlu0 %v1394_v8, %s2353_s30  ;;  %v1398_v9 = vsub.f32 1.0, %v1397_v17  ;;  %v2173_v17 = vld [vmem:[%s2913_s14 + $0x8] sm:$0xff]  ;;  %v2172_v8 = vld [vmem:[%s2913_s14] sm:$0xff] }
 0x804   :  { %1621 = vmatpush.bf16.msra.mxu0 %v2173_v17 }
 0x805   :  { %v1399_v11 = vmul.f32 %v2239_v3, %v1398_v9 }
 0x807   :  { %v1400_v13 = vadd.f32 %v2239_v3, %v1399_v11 }
 0x808   :  { %1622 = vmatpush.bf16.msra.mxu0 %v2172_v8 }
 0x809   :  { %v1404_v16 = vsel %vm1403_vm7, %v2239_v3, %v1400_v13 }
 0x80a   :  { %v1409_v19 = vsel %vm1406_vm8, %v1408_v15, %v1404_v16  ;;  %v2177_v15 = vld [vmem:[%s2915_s16 + $0x18] sm:$0xff]  ;;  %v2176_v16 = vld [vmem:[%s2915_s16 + $0x10] sm:$0xff] }
 0x80b   :  { %1415 = vrot.lane.b32.xlu1 %v1409_v19, %s2353_s30  ;;  %1681 = vmatpush.bf16.msrb.mxu1 %v2177_v15  ;;  %v2175_v19 = vld [vmem:[%s2915_s16 + $0x8] sm:$0xff] }
 0x80f   :  { %1682 = vmatpush.bf16.msrb.mxu1 %v2176_v16 }
 0x813   :  { %1683 = vmatpush.bf16.msrb.mxu1 %v2175_v19 }
 0x875   :  { %v1414_v20 = vpop.permute.xlu0 %1413 }
 0x876   :  { %v2837_v27 = vmul.f32 %v1414_v20, %v1371_v44  ;;  %v2174_v20 = vld [vmem:[%s2915_s16] sm:$0xff] }
 0x877   :  { %1684 = vmatpush.bf16.msrb.mxu1 %v2174_v20 }
 0x87d   :  { %v1416_v21 = vpop.permute.xlu1 %1415 }
 0x87e   :  { %v2839_v29 = vmul.f32 %v1416_v21, %v1372_v43  ;;  %v2179_v21 = vld [vmem:[%s2917_s18 + $0x8] sm:$0xff] }
 0x880   :  { %v1421_v30 = vpack.c.bf16 %v2839_v29, %v2837_v27 }
 0x882   :  { %2066 = vmatmul.msk.bf16.vlgmr.msra.gmra.mxu3 %vm226_vm1, %v1421_v30 }
 0x905   :  { %v1466_v45 = vpop.f32.mrf.mxu3 }
 0x906   :  { %v1467_v31 = vadd.f32 %v2739_v23, %v1466_v45 }
 0x908   :  { %v1471_v51 = vadd.f32 %v1467_v31, %v2600_v60 }
 0x90a   :  { %v1473_v47 = vmul.f32 0.70710677, %v1471_v51 }
 0x90c   :  { %2068 = vmatmul.msk.f32.vlgmr.msrb.gmra.mxu0 %vm158_vm0, %v1473_v47 }
 0x90d   :  { %v1468_v32 = vpop.f32.mrf.mxu3  ;;  %1721 = vmatpush.bf16.msrb.mxu0 %v2179_v21 }
 0x90e   :  { %v1469_v56 = vadd.f32 %v2739_v23, %v1468_v32 }
 0x910   :  { %v1472_v33 = vadd.f32 %v1469_v56, %v2605_v61 }
 0x912   :  { %v1474_v34 = vmul.f32 0.70710677, %v1472_v33 }
 0x914   :  { %2070 = vmatmul.msk.f32.vlgmr.msra.gmra.mxu1 %vm158_vm0, %v1474_v34 }
 0x989   :  { %v1495_v35 = vpop.f32.mrf.mxu0 }
 0x98a   :  { %v1521_v36 = vsel %vm689_vm4, %v1495_v35, -1e+30 }
 0x98b   :  { %1523 = vmax.xlane.f32.xlu2 %v1521_v36 }
 0x991   :  { %v1518_v37 = vpop.f32.mrf.mxu1 }
 0x992   :  { %v1522_v60 = vsel %vm689_vm4, %v1518_v37, -1e+30 }
 0x993   :  { %1525 = vmax.xlane.f32.xlu2 %v1522_v60 }
 0x9fe   :  { %v1524_v38 = vpop.xlane.xlu2 %1523 }
 0x9ff   :  { %v1527_v18 = vsub.f32 %v1521_v36, %v1524_v38 }
 0xa01   :  { %v1529_v22 = vmul.f32 1.442695, %v1527_v18 }
 0xa03   :  { %2240 = vpow2.f32 %v1529_v22 }
 0xa06   :  { %v1526_v23 = vpop.xlane.xlu2 %1525 }
 0xa07   :  { %v1528_v24 = vsub.f32 %v1522_v60, %v1526_v23 }
 0xa09   :  { %v2241_v61 = vpop.eup %2240  ;;  %v1531_v39 = vmul.f32 1.442695, %v1528_v24 }
 0xa0a   :  { %1533 = vadd.xlane.f32.xlu0 %v2241_v61 }
 0xa0b   :  { %2242 = vpow2.f32 %v1531_v39 }
 0xa11   :  { %v2243_v40 = vpop.eup %2242 }
 0xa12   :  { %1535 = vadd.xlane.f32.xlu2 %v2243_v40 }
 0xa7d   :  { %v1534_v41 = vpop.xlane.xlu0 %1533 }
 0xa7e   :  { %2244 = vrcp.f32 %v1534_v41  ;;  %v1548_v14 = vand.u32 2147483648, %v1534_v41  ;;  %v1546_v48 = vand.u32 2147483647, %v1534_v41  ;;  %vm1542_vm9 = vweird.f32 %v1534_v41 }
 0xa80   :  { %v1549_v43 = vor.u32 1.1754944e-38, %v1548_v14  ;;  %vm1547_vm11 = vcmp.eq.f32.partialorder %v1546_v48, 8.507059e+37 }
 0xa84   :  { %v2245_v7 = vpop.eup %2244 }
 0xa85   :  { %v1538_v42 = vmul.f32 %v2245_v7, %v1534_v41  ;;  %v1536_v44 = vpop.xlane.xlu2 %1535  ;;  %vm1543_vm4 = vweird.f32 %v2245_v7 }
 0xa86   :  { %2246 = vrcp.f32 %v1536_v44  ;;  %vm1544_vm10 = vmor %vm1542_vm9, %vm1543_vm4  ;;  %v1562_v58 = vand.u32 2147483648, %v1536_v44  ;;  %v1560_v62 = vand.u32 2147483647, %v1536_v44  ;;  %vm1556_vm6 = vweird.f32 %v1536_v44 }
 0xa87   :  { %v1539_v46 = vsub.f32 1.0, %v1538_v42 }
 0xa88   :  { %v1563_v1 = vor.u32 1.1754944e-38, %v1562_v58  ;;  %vm1561_vm3 = vcmp.eq.f32.partialorder %v1560_v62, 8.507059e+37 }
 0xa89   :  { %v1540_v49 = vmul.f32 %v2245_v7, %v1539_v46 }
 0xa8b   :  { %v1541_v50 = vadd.f32 %v2245_v7, %v1540_v49 }
 0xa8c   :  { %v2247_v52 = vpop.eup %2246 }
 0xa8d   :  { %v1545_v53 = vsel %vm1544_vm10, %v2245_v7, %v1541_v50  ;;  %v1552_v55 = vmul.f32 %v2247_v52, %v1536_v44  ;;  %vm1557_vm12 = vweird.f32 %v2247_v52 }
 0xa8e   :  { %v1550_v54 = vsel %vm1547_vm11, %v1549_v43, %v1545_v53  ;;  %vm1558_vm2 = vmor %vm1556_vm6, %vm1557_vm12 }
 0xa8f   :  { %v1553_v2 = vsub.f32 1.0, %v1552_v55  ;;  %v1565_v57 = vmul.f32 %v2241_v61, %v1550_v54 }
 0xa91   :  { %v1554_v59 = vmul.f32 %v2247_v52, %v1553_v2  ;;  %v1567_v63 = vpack.c.bf16 %v1565_v57, %v1565_v57  ;;  %1731 = vst [vmem:[#allocation8] sm:$0xff] %v1565_v57 }
 0xa93   :  { %v1555_v0 = vadd.f32 %v2247_v52, %v1554_v59  ;;  %1577 = vmatmul.bf16.vlgmr.msra.gmra.mxu2 %v1567_v63 }
 0xa95   :  { %v1559_v4 = vsel %vm1558_vm2, %v2247_v52, %v1555_v0 }
 0xa96   :  { %v1564_v3 = vsel %vm1561_vm3, %v1563_v1, %v1559_v4 }
 0xa97   :  { %v1566_v5 = vmul.f32 %v2243_v40, %v1564_v3 }
 0xa99   :  { %v1568_v6 = vpack.c.bf16 %v1566_v5, %v1566_v5  ;;  %1732 = vst [vmem:[#allocation8 + $0x8] sm:$0xff] %v1566_v5 }
 0xa9b   :  { %1590 = vmatmul.bf16.vlgmr.msrb.gmra.mxu3 %v1568_v6 }
 0xb16   :  { %v1578_v9 = vpop.f32.mrf.mxu2 }
 0xb1e   :  { %v1580_v26 = vpop.f32.mrf.mxu2  ;;  %v1591_v11 = vpop.f32.mrf.mxu3 }
 0xb1f   :  { %v1595_v12 = vpack.c.bf16 %v1591_v11, %v1578_v9 }
 0xb21   :  { %2079 = vmatmul.msk.bf16.vlgmr.msra.gmra.mxu0 %vm158_vm0, %v1595_v12 }
 0xb26   :  { %v1593_v13 = vpop.f32.mrf.mxu3 }
 0xb9e   :  { %v1624_v30 = vpop.f32.mrf.mxu0 }
 0xb9f   :  { %v1625_v45 = vadd.f32 %v2787_v10, %v1624_v30 }
 0xba1   :  { %v1629_v31 = vadd.f32 %v1625_v45, %v2837_v27  ;;  %v2178_v27 = vld [vmem:[%s2917_s18] sm:$0xff]  ;;  %s2358_s18 = smov 128  }
 0xba2   :  { %1722 = vmatpush.bf16.msrb.mxu0 %v2178_v27  ;;  %1758 = dma.vmem_to_hbm [thread:$0]  %s1751_s27, 256, %s1753_s29, [#allocation9], %s2358_s18, %s2358_s18, %s2359_s8  }
 0xba3   :  { %v1631_v47 = vmul.f32 0.70710677, %v1629_v31 }
 0xba5   :  { %v1633_v33 = vadd.f32 %v1631_v47, %v2794_v25 }
 0xba6   :  { %v1626_v51 = vpop.f32.mrf.mxu0 }
 0xba7   :  { %v1627_v32 = vadd.f32 %v2787_v10, %v1626_v51  ;;  %v1635_v36 = vmul.f32 0.70710677, %v1633_v33  ;;  %v2198_v10 = vld [vmem:[%s2916_s17] ss:$0 sm:$0xff]  ;;  %s2360_s17 = smov [#allocation7]  }
 0xba8   :  { %s1737_s11 = sshll.u32 %s2360_s17, 4  ;;  %s1738_s11 = int_to_ptr.vmem [resolvable:$true] %s1737_s11 }
 0xba9   :  { %v1630_v56 = vadd.f32 %v1627_v32, %v2839_v29 }
 0xbab   :  { %v1632_v34 = vmul.f32 0.70710677, %v1630_v56 }
 0xbad   :  { %v1634_v35 = vadd.f32 %v1632_v34, %v2797_v28  ;;  %v2199_v28 = vld [vmem:[%s2918_s19] ss:$0 sm:$0xff] }
 0xbaf   :  { %v1636_v37 = vmul.f32 0.70710677, %v1634_v35 }
 0xbb1   :  { %v1637_v60 = vpack.c.bf16 %v1636_v37, %v1635_v36 }
 0xbb3   :  { %2096 = vmatmul.msk.bf16.vlgmr.msrb.gmra.mxu1 %vm226_vm1, %v1637_v60 }
 0xc30   :  { %v1686_v38 = vpop.f32.mrf.mxu1 }
 0xc31   :  { %v1687_v25 = vadd.f32 %v2198_v10, %v1686_v38 }
 0xc38   :  { %v1688_v29 = vpop.f32.mrf.mxu1 }
 0xc39   :  { %v1689_v18 = vadd.f32 %v2198_v10, %v1688_v29 }
 0xc3b   :  { %v1691_v22 = vpack.c.bf16 %v1689_v18, %v1687_v25 }
 0xc3d   :  { %2105 = vmatmul.msk.bf16.vlgmr.msrb.gmra.mxu0 %vm158_vm0, %v1691_v22 }
 0xcba   :  { %v1724_v23 = vpop.f32.mrf.mxu0 }
 0xcbb   :  { %v1725_v24 = vadd.f32 %v2199_v28, %v1724_v23 }
 0xcbd   :  { %1729 = vst [vmem:[#allocation7] sm:$0xff] %v1725_v24 }
 0xcc2   :  { %v1726_v61 = vpop.f32.mrf.mxu0 }
 0xcc3   :  { %v1727_v39 = vadd.f32 %v2199_v28, %v1726_v61 }
 0xcc5   :  { %1730 = vst [vmem:[#allocation7 + $0x8] sm:$0xff] %v1727_v39 }
 0xcc6   :  { %1745 = dma.vmem_to_hbm [thread:$0]  %s1738_s11, 256, %s1740_s5, [#allocation4], %s2358_s18, %s2358_s18, %s2359_s8  }
 0xcc7   :  { %2348 = dma.done.wait [#allocation4], 256  }
 0xcc8   :  { %2349 = vsyncadd [#allocation4], 4294967040 }
 0xcc9   :  { %2350 = dma.done.wait [#allocation9], 256  }
 0xcca   :  { %2351 = vsyncadd [#allocation9], 4294967040 }
 0xccb   :  { %1767 = vsyncpa [#allocation3], 1 }
 0xccc   :  { %1768 = vsyncpa [#allocation6], 1 }
 0xccd   :  { %1769 = vsyncpa [#allocation4], 1 }
 0xcce   :  { %1770 = vsyncpa [#allocation9], 1 }

</bundles_post_ra>
